<compile_context>
chip_gen: v7x
topology: tpu7x:2x2x1
jax: 0.10.0
libtpu: 0.0.40
codegen_flags: <defaults>
</compile_context>

<pallas_src>
import numpy as np
import jax
import jax.numpy as jnp
from jax import lax
from jax.experimental import pallas as pl
from jax.experimental.pallas import tpu as pltpu

EPS = 1e-5            # InstanceNorm2d eps
NEG_SLOPE = 0.01      # LeakyReLU negative_slope

# Cast matmul inputs to this dtype (accumulation stays f32 via
# preferred_element_type).  jnp.bfloat16 gives 2-4x MXU throughput but is
# slightly less precise; kept f32 so the 1e-3 correctness check holds exactly.
MATMUL_DTYPE = jnp.float32

ENCODER_CFG = dict(
    input_channels=4,
    n_stages=2,
    features_per_stage=[8, 16],
    kernel_sizes=[3, 3],
    strides=[1, 2],
    n_conv_per_stage=[2, 2],
)


# ----------------------------------------------------------------------------
# Fused whole-encoder kernel (one grid step == one sample).
# Activations are packed 2-D:  a[h, w*Cin + ci]  (pixel-major, channel-minor).
# ----------------------------------------------------------------------------
def _make_encoder_kernel(layers):
    """layers: list of dicts with static ints H, W, Ho, Wo, Cin, Cout, stride, k."""

    def kernel(x_ref, *refs):
        out_ref = refs[-1]

        # ---- constants hoisted to the top of the (once-traced) body --------
        # Row-selector matrices R_dh (Ho, H):
        #   R_dh[ho, r] = 1  iff  r == stride*ho + dh - k//2
        # (rows that fall outside [0, H) simply never match -> zero padding).
        rsel_cache = {}
        # Channel-broadcast matrices B (WC, WC):
        #   B[p, q] = 1 iff (p mod Cout) == (q mod Cout)
        # so (row_sum @ B) broadcasts per-channel sums back over the packed
        # (wo, co) lane layout.  Cout is a power of two -> mod via bitwise AND.
        bcast_cache = {}
        for d in layers:
            rk = (d["Ho"], d["H"], d["stride"], d["k"])
            if rk not in rsel_cache:
                ho_i = lax.broadcasted_iota(jnp.int32, (d["Ho"], d["H"]), 0)
                r_i = lax.broadcasted_iota(jnp.int32, (d["Ho"], d["H"]), 1)
                rsel_cache[rk] = [
                    jnp.where(r_i == d["stride"] * ho_i + (dh - d["k"] // 2),
                              1.0, 0.0).astype(jnp.float32)
                    for dh in range(d["k"])
                ]
            wc = d["Wo"] * d["Cout"]
            bk = (wc, d["Cout"])
            if bk not in bcast_cache:
                p_i = lax.broadcasted_iota(jnp.int32, (wc, wc), 0)
                q_i = lax.broadcasted_iota(jnp.int32, (wc, wc), 1)
                msk = d["Cout"] - 1  # power of two
                bcast_cache[bk] = jnp.where(
                    (p_i & msk) == (q_i & msk), 1.0, 0.0).astype(jnp.float32)

        a = x_ref[0]  # (H0, W0*Cin0) packed input activation for this sample

        for li, d in enumerate(layers):
            m_ref = refs[2 * li]       # (k, W*Cin, Wo*Cout) width-unrolled weights
            gb_ref = refs[2 * li + 1]  # (2, Wo*Cout) tiled gamma / beta rows
            Ho, Wo, Cout = d["Ho"], d["Wo"], d["Cout"]
            wc = Wo * Cout
            R = rsel_cache[(Ho, d["H"], d["stride"], d["k"])]
            B = bcast_cache[(wc, Cout)]

            # ---- conv (bias dropped: exactly cancelled by InstanceNorm) ----
            y = jnp.zeros((Ho, wc), jnp.float32)
            for dh in range(d["k"]):
                rows = jnp.dot(R[dh], a, preferred_element_type=jnp.float32)
                y = y + jnp.dot(rows.astype(MATMUL_DTYPE),
                                m_ref[dh].astype(MATMUL_DTYPE),
                                preferred_element_type=jnp.float32)

            # ---- InstanceNorm (one-pass stats) + folded affine + LeakyReLU --
            inv_n = 1.0 / (Ho * Wo)
            s1 = jnp.sum(y, axis=0, keepdims=True)          # (1, WC)
            s2 = jnp.sum(y * y, axis=0, keepdims=True)       # (1, WC)
            mean = jnp.dot(s1, B, preferred_element_type=jnp.float32) * inv_n
            ex2 = jnp.dot(s2, B, preferred_element_type=jnp.float32) * inv_n
            var = ex2 - mean * mean                           # biased (PyTorch IN)
            scale = gb_ref[0:1, :] * lax.rsqrt(var + EPS)     # gamma folded
            shift = gb_ref[1:2, :] - mean * scale             # beta folded
            y = y * scale + shift
            a = jnp.maximum(y, NEG_SLOPE * y)                 # LeakyReLU

        out_ref[0] = a  # (Ho_last, Wo_last*Cout_last) -> lane-dense 128-wide store

    return kernel


# ----------------------------------------------------------------------------
# Host-side weight packing (pure weight preprocessing, done once).
# M[dh][wi*Cin+ci, wo*Cout+co] = sum_dw [wi == stride*wo + dw - k//2] * w[dh,dw,ci,co]
# ----------------------------------------------------------------------------
def _pack_layer(w_hwio, gamma, beta, w_in, stride):
    k, _, cin, cout = w_hwio.shape
    pad = k // 2
    wo_n = (w_in + 2 * pad - k) // stride + 1
    wo = np.arange(wo_n)[:, None]
    wi = np.arange(w_in)[None, :]
    T = np.stack([(wi == stride * wo + dw - pad) for dw in range(k)]
                 ).astype(np.float32)                       # (k, Wo, W_in)
    M = jnp.einsum("dOI,hdio->hIiOo", jnp.asarray(T), w_hwio.astype(jnp.float32))
    M = M.reshape(k, w_in * cin, wo_n * cout)
    g_row = jnp.tile(gamma.astype(jnp.float32), (wo_n,)).reshape(1, wo_n * cout)
    b_row = jnp.tile(beta.astype(jnp.float32), (wo_n,)).reshape(1, wo_n * cout)
    gb = jnp.concatenate([g_row, b_row], axis=0)            # (2, Wo*Cout)
    return M, gb, wo_n


# ----------------------------------------------------------------------------
# PlainConvEncoder wrapper (forward pass only)
# ----------------------------------------------------------------------------
def init_encoder_params(key, cfg):
    params = []
    cin = cfg["input_channels"]
    layer_idx = 0
    for s in range(cfg["n_stages"]):
        cout = cfg["features_per_stage"][s]
        k = cfg["kernel_sizes"][s]
        stage = []
        for _ in range(cfg["n_conv_per_stage"][s]):
            kk = jax.random.fold_in(key, layer_idx)
            kw_, kb_, kg_, kbe_ = jax.random.split(kk, 4)
            w = 0.1 * jax.random.normal(kw_, (k, k, cin, cout), jnp.float32)
            b = 0.05 * jax.random.normal(kb_, (cout,), jnp.float32)  # cancelled by IN
            gamma = 1.0 + 0.1 * jax.random.normal(kg_, (cout,), jnp.float32)
            beta = 0.1 * jax.random.normal(kbe_, (cout,), jnp.float32)
            stage.append(dict(w=w, b=b, gamma=gamma, beta=beta))
            cin = cout
            layer_idx += 1
        params.append(stage)
    return params


def plain_conv_encoder_forward(x_nchw, params, cfg):
    N, C, H, W = x_nchw.shape
    # NCHW -> packed (N, H, W*C), pixel-major / channel-minor
    x2 = jnp.transpose(x_nchw, (0, 2, 3, 1)).reshape(N, H, W * C).astype(jnp.float32)

    layers, operands = [], []
    hc, wc_, cc = H, W, C
    for s, stage in enumerate(params):
        for c, layer in enumerate(stage):
            stride = cfg["strides"][s] if c == 0 else 1
            k = cfg["kernel_sizes"][s]
            cout = cfg["features_per_stage"][s]
            assert cout & (cout - 1) == 0, \
                "features_per_stage must be powers of two (lane mod via bitwise AND)"
            pad = k // 2
            ho = (hc + 2 * pad - k) // stride + 1
            M, gb, wo = _pack_layer(layer["w"], layer["gamma"], layer["beta"],
                                    wc_, stride)
            layers.append(dict(H=hc, W=wc_, Ho=ho, Wo=wo, Cin=cc, Cout=cout,
                               stride=stride, k=k))
            operands.extend([M, gb])
            hc, wc_, cc = ho, wo, cout

    in_specs = [pl.BlockSpec((1, H, W * C), lambda n: (n, 0, 0))]
    for op in operands:
        # Weight/affine operands: constant index_map -> DMA'd once per core.
        if op.ndim == 3:
            in_specs.append(pl.BlockSpec(op.shape, lambda n: (0, 0, 0)))
        else:
            in_specs.append(pl.BlockSpec(op.shape, lambda n: (0, 0)))

    out = pl.pallas_call(
        _make_encoder_kernel(layers),
        out_shape=jax.ShapeDtypeStruct((N, hc, wc_ * cc), jnp.float32),
        grid=(N,),
        in_specs=in_specs,
        out_specs=pl.BlockSpec((1, hc, wc_ * cc), lambda n: (n, 0, 0)),
        compiler_params=pltpu.CompilerParams(
            dimension_semantics=("parallel",),        # N=2 -> both v7x cores busy
            vmem_limit_bytes=32 * 1024 * 1024,        # explicit; well under v7x 64 MiB
        ),
    )(x2, *operands)

    # packed (N, Ho, Wo*Cout) -> NCHW  (return_skips=False -> ret[-1] only)
    return jnp.transpose(out.reshape(N, hc, wc_, cc), (0, 3, 1, 2))


# ----------------------------------------------------------------------------
# Pure-JAX reference (for correctness check only).  Includes the conv bias to
# demonstrate that dropping it inside the kernel is exact under InstanceNorm.
# ----------------------------------------------------------------------------
def _ref_block(x_nhwc, w_hwio, b, gamma, beta, stride):
    p = w_hwio.shape[0] // 2
    y = lax.conv_general_dilated(
        x_nhwc, w_hwio, window_strides=(stride, stride),
        padding=[(p, p), (p, p)],
        dimension_numbers=("NHWC", "HWIO", "NHWC")) + b
    mean = jnp.mean(y, axis=(1, 2), keepdims=True)
    var = jnp.mean(jnp.square(y - mean), axis=(1, 2), keepdims=True)
    y = (y - mean) * lax.rsqrt(var + EPS) * gamma + beta
    return jnp.where(y >= 0.0, y, NEG_SLOPE * y)


def reference_forward(x_nchw, params, cfg):
    x = jnp.transpose(x_nchw, (0, 2, 3, 1))
    for s, stage in enumerate(params):
        for c, layer in enumerate(stage):
            stride = cfg["strides"][s] if c == 0 else 1
            x = _ref_block(x, layer["w"], layer["b"],
                           layer["gamma"], layer["beta"], stride)
    return jnp.transpose(x, (0, 3, 1, 2))


if __name__ == "__main__":
    key = jax.random.PRNGKey(0)
    kx, kp = jax.random.split(key)
    x = jax.random.normal(kx, (2, 4, 16, 16), jnp.float32)   # NCHW, like PyTorch
    params = init_encoder_params(kp, ENCODER_CFG)

    fwd = jax.jit(lambda xx: plain_conv_encoder_forward(xx, params, ENCODER_CFG))
    out = jax.block_until_ready(fwd(x))

    ref = jax.block_until_ready(reference_forward(x, params, ENCODER_CFG))
    assert out.shape == (2, 16, 8, 8), out.shape
    assert np.allclose(np.asarray(out), np.asarray(ref), rtol=2e-3, atol=2e-3), \
        "Pallas encoder output mismatch vs reference"
    print("KERNEL_OK")
</pallas_src>

<mosaic_0001>
module attributes {stable_mosaic.version = 11 : i64} {
  func.func @kernel(%arg0: i32, %arg1: memref<1x16x64xf32, #tpu.memory_space<vmem>>, %arg2: memref<3x64x128xf32, #tpu.memory_space<vmem>>, %arg3: memref<2x128xf32, #tpu.memory_space<vmem>>, %arg4: memref<3x128x128xf32, #tpu.memory_space<vmem>>, %arg5: memref<2x128xf32, #tpu.memory_space<vmem>>, %arg6: memref<3x128x128xf32, #tpu.memory_space<vmem>>, %arg7: memref<2x128xf32, #tpu.memory_space<vmem>>, %arg8: memref<3x128x128xf32, #tpu.memory_space<vmem>>, %arg9: memref<2x128xf32, #tpu.memory_space<vmem>>, %arg10: memref<1x8x128xf32, #tpu.memory_space<vmem>>) attributes {dimension_semantics = [#tpu.dimension_semantics<parallel>], iteration_bounds = array<i64: 2>, scalar_prefetch = 0 : i64, scratch_operands = 0 : i64, tpu.core_type = #tpu.core_type<tc>, window_params = [{transform_indices = @transform_0, window_bounds = array<i64: 1, 16, 64>}, {pipeline_mode = #tpu.pipeline_mode<synchronous>, transform_indices = @transform_1, window_bounds = array<i64: 3, 64, 128>}, {pipeline_mode = #tpu.pipeline_mode<synchronous>, transform_indices = @transform_2, window_bounds = array<i64: 2, 128>}, {pipeline_mode = #tpu.pipeline_mode<synchronous>, transform_indices = @transform_3, window_bounds = array<i64: 3, 128, 128>}, {pipeline_mode = #tpu.pipeline_mode<synchronous>, transform_indices = @transform_4, window_bounds = array<i64: 2, 128>}, {pipeline_mode = #tpu.pipeline_mode<synchronous>, transform_indices = @transform_5, window_bounds = array<i64: 3, 128, 128>}, {pipeline_mode = #tpu.pipeline_mode<synchronous>, transform_indices = @transform_6, window_bounds = array<i64: 2, 128>}, {pipeline_mode = #tpu.pipeline_mode<synchronous>, transform_indices = @transform_7, window_bounds = array<i64: 3, 128, 128>}, {pipeline_mode = #tpu.pipeline_mode<synchronous>, transform_indices = @transform_8, window_bounds = array<i64: 2, 128>}, {transform_indices = @transform_9, window_bounds = array<i64: 1, 8, 128>}]} {
    %0 = tpu.iota {dimensions = array<i32: 0>} : vector<16x16xi32>
    %1 = tpu.iota {dimensions = array<i32: 1>} : vector<16x16xi32>
    %c1_i32 = arith.constant 1 : i32
    %2 = vector.broadcast %c1_i32 : i32 to vector<16x16xi32>
    %3 = arith.muli %2, %0 : vector<16x16xi32>
    %c-1_i32 = arith.constant -1 : i32
    %4 = vector.broadcast %c-1_i32 : i32 to vector<16x16xi32>
    %5 = arith.addi %3, %4 : vector<16x16xi32>
    %6 = arith.cmpi eq, %1, %5 : vector<16x16xi32>
    %cst = arith.constant 1.000000e+00 : f32
    %cst_0 = arith.constant 0.000000e+00 : f32
    %7 = vector.broadcast %cst : f32 to vector<16x16xf32>
    %8 = vector.broadcast %cst_0 : f32 to vector<16x16xf32>
    %9 = arith.select %6, %7, %8 : vector<16x16xi1>, vector<16x16xf32>
    %c1_i32_1 = arith.constant 1 : i32
    %10 = vector.broadcast %c1_i32_1 : i32 to vector<16x16xi32>
    %11 = arith.muli %10, %0 : vector<16x16xi32>
    %c0_i32 = arith.constant 0 : i32
    %12 = vector.broadcast %c0_i32 : i32 to vector<16x16xi32>
    %13 = arith.addi %11, %12 : vector<16x16xi32>
    %14 = arith.cmpi eq, %1, %13 : vector<16x16xi32>
    %cst_2 = arith.constant 1.000000e+00 : f32
    %cst_3 = arith.constant 0.000000e+00 : f32
    %15 = vector.broadcast %cst_2 : f32 to vector<16x16xf32>
    %16 = vector.broadcast %cst_3 : f32 to vector<16x16xf32>
    %17 = arith.select %14, %15, %16 : vector<16x16xi1>, vector<16x16xf32>
    %c1_i32_4 = arith.constant 1 : i32
    %18 = vector.broadcast %c1_i32_4 : i32 to vector<16x16xi32>
    %19 = arith.muli %18, %0 : vector<16x16xi32>
    %c1_i32_5 = arith.constant 1 : i32
    %20 = vector.broadcast %c1_i32_5 : i32 to vector<16x16xi32>
    %21 = arith.addi %19, %20 : vector<16x16xi32>
    %22 = arith.cmpi eq, %1, %21 : vector<16x16xi32>
    %cst_6 = arith.constant 1.000000e+00 : f32
    %cst_7 = arith.constant 0.000000e+00 : f32
    %23 = vector.broadcast %cst_6 : f32 to vector<16x16xf32>
    %24 = vector.broadcast %cst_7 : f32 to vector<16x16xf32>
    %25 = arith.select %22, %23, %24 : vector<16x16xi1>, vector<16x16xf32>
    %26 = tpu.iota {dimensions = array<i32: 0>} : vector<128x128xi32>
    %27 = tpu.iota {dimensions = array<i32: 1>} : vector<128x128xi32>
    %c7_i32 = arith.constant 7 : i32
    %28 = vector.broadcast %c7_i32 : i32 to vector<128x128xi32>
    %29 = arith.andi %26, %28 : vector<128x128xi32>
    %c7_i32_8 = arith.constant 7 : i32
    %30 = vector.broadcast %c7_i32_8 : i32 to vector<128x128xi32>
    %31 = arith.andi %27, %30 : vector<128x128xi32>
    %32 = arith.cmpi eq, %29, %31 : vector<128x128xi32>
    %cst_9 = arith.constant 1.000000e+00 : f32
    %cst_10 = arith.constant 0.000000e+00 : f32
    %33 = vector.broadcast %cst_9 : f32 to vector<128x128xf32>
    %34 = vector.broadcast %cst_10 : f32 to vector<128x128xf32>
    %35 = arith.select %32, %33, %34 : vector<128x128xi1>, vector<128x128xf32>
    %36 = tpu.iota {dimensions = array<i32: 0>} : vector<8x16xi32>
    %37 = tpu.iota {dimensions = array<i32: 1>} : vector<8x16xi32>
    %c2_i32 = arith.constant 2 : i32
    %38 = vector.broadcast %c2_i32 : i32 to vector<8x16xi32>
    %39 = arith.muli %38, %36 : vector<8x16xi32>
    %c-1_i32_11 = arith.constant -1 : i32
    %40 = vector.broadcast %c-1_i32_11 : i32 to vector<8x16xi32>
    %41 = arith.addi %39, %40 : vector<8x16xi32>
    %42 = arith.cmpi eq, %37, %41 : vector<8x16xi32>
    %cst_12 = arith.constant 1.000000e+00 : f32
    %cst_13 = arith.constant 0.000000e+00 : f32
    %43 = vector.broadcast %cst_12 : f32 to vector<8x16xf32>
    %44 = vector.broadcast %cst_13 : f32 to vector<8x16xf32>
    %45 = arith.select %42, %43, %44 : vector<8x16xi1>, vector<8x16xf32>
    %c2_i32_14 = arith.constant 2 : i32
    %46 = vector.broadcast %c2_i32_14 : i32 to vector<8x16xi32>
    %47 = arith.muli %46, %36 : vector<8x16xi32>
    %c0_i32_15 = arith.constant 0 : i32
    %48 = vector.broadcast %c0_i32_15 : i32 to vector<8x16xi32>
    %49 = arith.addi %47, %48 : vector<8x16xi32>
    %50 = arith.cmpi eq, %37, %49 : vector<8x16xi32>
    %cst_16 = arith.constant 1.000000e+00 : f32
    %cst_17 = arith.constant 0.000000e+00 : f32
    %51 = vector.broadcast %cst_16 : f32 to vector<8x16xf32>
    %52 = vector.broadcast %cst_17 : f32 to vector<8x16xf32>
    %53 = arith.select %50, %51, %52 : vector<8x16xi1>, vector<8x16xf32>
    %c2_i32_18 = arith.constant 2 : i32
    %54 = vector.broadcast %c2_i32_18 : i32 to vector<8x16xi32>
    %55 = arith.muli %54, %36 : vector<8x16xi32>
    %c1_i32_19 = arith.constant 1 : i32
    %56 = vector.broadcast %c1_i32_19 : i32 to vector<8x16xi32>
    %57 = arith.addi %55, %56 : vector<8x16xi32>
    %58 = arith.cmpi eq, %37, %57 : vector<8x16xi32>
    %cst_20 = arith.constant 1.000000e+00 : f32
    %cst_21 = arith.constant 0.000000e+00 : f32
    %59 = vector.broadcast %cst_20 : f32 to vector<8x16xf32>
    %60 = vector.broadcast %cst_21 : f32 to vector<8x16xf32>
    %61 = arith.select %58, %59, %60 : vector<8x16xi1>, vector<8x16xf32>
    %62 = tpu.iota {dimensions = array<i32: 0>} : vector<128x128xi32>
    %63 = tpu.iota {dimensions = array<i32: 1>} : vector<128x128xi32>
    %c15_i32 = arith.constant 15 : i32
    %64 = vector.broadcast %c15_i32 : i32 to vector<128x128xi32>
    %65 = arith.andi %62, %64 : vector<128x128xi32>
    %c15_i32_22 = arith.constant 15 : i32
    %66 = vector.broadcast %c15_i32_22 : i32 to vector<128x128xi32>
    %67 = arith.andi %63, %66 : vector<128x128xi32>
    %68 = arith.cmpi eq, %65, %67 : vector<128x128xi32>
    %cst_23 = arith.constant 1.000000e+00 : f32
    %cst_24 = arith.constant 0.000000e+00 : f32
    %69 = vector.broadcast %cst_23 : f32 to vector<128x128xf32>
    %70 = vector.broadcast %cst_24 : f32 to vector<128x128xf32>
    %71 = arith.select %68, %69, %70 : vector<128x128xi1>, vector<128x128xf32>
    %72 = tpu.iota {dimensions = array<i32: 0>} : vector<8x8xi32>
    %73 = tpu.iota {dimensions = array<i32: 1>} : vector<8x8xi32>
    %c1_i32_25 = arith.constant 1 : i32
    %74 = vector.broadcast %c1_i32_25 : i32 to vector<8x8xi32>
    %75 = arith.muli %74, %72 : vector<8x8xi32>
    %c-1_i32_26 = arith.constant -1 : i32
    %76 = vector.broadcast %c-1_i32_26 : i32 to vector<8x8xi32>
    %77 = arith.addi %75, %76 : vector<8x8xi32>
    %78 = arith.cmpi eq, %73, %77 : vector<8x8xi32>
    %cst_27 = arith.constant 1.000000e+00 : f32
    %cst_28 = arith.constant 0.000000e+00 : f32
    %79 = vector.broadcast %cst_27 : f32 to vector<8x8xf32>
    %80 = vector.broadcast %cst_28 : f32 to vector<8x8xf32>
    %81 = arith.select %78, %79, %80 : vector<8x8xi1>, vector<8x8xf32>
    %c1_i32_29 = arith.constant 1 : i32
    %82 = vector.broadcast %c1_i32_29 : i32 to vector<8x8xi32>
    %83 = arith.muli %82, %72 : vector<8x8xi32>
    %c0_i32_30 = arith.constant 0 : i32
    %84 = vector.broadcast %c0_i32_30 : i32 to vector<8x8xi32>
    %85 = arith.addi %83, %84 : vector<8x8xi32>
    %86 = arith.cmpi eq, %73, %85 : vector<8x8xi32>
    %cst_31 = arith.constant 1.000000e+00 : f32
    %cst_32 = arith.constant 0.000000e+00 : f32
    %87 = vector.broadcast %cst_31 : f32 to vector<8x8xf32>
    %88 = vector.broadcast %cst_32 : f32 to vector<8x8xf32>
    %89 = arith.select %86, %87, %88 : vector<8x8xi1>, vector<8x8xf32>
    %c1_i32_33 = arith.constant 1 : i32
    %90 = vector.broadcast %c1_i32_33 : i32 to vector<8x8xi32>
    %91 = arith.muli %90, %72 : vector<8x8xi32>
    %c1_i32_34 = arith.constant 1 : i32
    %92 = vector.broadcast %c1_i32_34 : i32 to vector<8x8xi32>
    %93 = arith.addi %91, %92 : vector<8x8xi32>
    %94 = arith.cmpi eq, %73, %93 : vector<8x8xi32>
    %cst_35 = arith.constant 1.000000e+00 : f32
    %cst_36 = arith.constant 0.000000e+00 : f32
    %95 = vector.broadcast %cst_35 : f32 to vector<8x8xf32>
    %96 = vector.broadcast %cst_36 : f32 to vector<8x8xf32>
    %97 = arith.select %94, %95, %96 : vector<8x8xi1>, vector<8x8xf32>
    %c0 = arith.constant 0 : index
    %c0_37 = arith.constant 0 : index
    %c0_38 = arith.constant 0 : index
    %98 = vector.load %arg1[%c0, %c0_37, %c0_38] : memref<1x16x64xf32, #tpu.memory_space<vmem>>, vector<1x16x64xf32>
    %99 = vector.shape_cast %98 : vector<1x16x64xf32> to vector<16x64xf32>
    %cst_39 = arith.constant 0.000000e+00 : f32
    %100 = vector.broadcast %cst_39 : f32 to vector<16x128xf32>
    %cst_40 = arith.constant dense<0.000000e+00> : vector<16x64xf32>
    %101 = tpu.matmul %9, %99, %cst_40 {dimension_numbers = #tpu.dot_dimension_numbers<[1], [0], [0], [1], [0, 0, 1, 1], [], []>} : vector<16x16xf32>, vector<16x64xf32>, vector<16x64xf32> -> vector<16x64xf32>
    %c0_41 = arith.constant 0 : index
    %c0_42 = arith.constant 0 : index
    %c0_43 = arith.constant 0 : index
    %102 = vector.load %arg2[%c0_41, %c0_42, %c0_43] : memref<3x64x128xf32, #tpu.memory_space<vmem>>, vector<1x64x128xf32>
    %103 = vector.shape_cast %102 : vector<1x64x128xf32> to vector<64x128xf32>
    %cst_44 = arith.constant dense<0.000000e+00> : vector<16x128xf32>
    %104 = tpu.matmul %101, %103, %cst_44 {dimension_numbers = #tpu.dot_dimension_numbers<[1], [0], [0], [1], [0, 0, 1, 1], [], []>} : vector<16x64xf32>, vector<64x128xf32>, vector<16x128xf32> -> vector<16x128xf32>
    %105 = arith.addf %100, %104 : vector<16x128xf32>
    %cst_45 = arith.constant dense<0.000000e+00> : vector<16x64xf32>
    %106 = tpu.matmul %17, %99, %cst_45 {dimension_numbers = #tpu.dot_dimension_numbers<[1], [0], [0], [1], [0, 0, 1, 1], [], []>} : vector<16x16xf32>, vector<16x64xf32>, vector<16x64xf32> -> vector<16x64xf32>
    %c1 = arith.constant 1 : index
    %c0_46 = arith.constant 0 : index
    %c0_47 = arith.constant 0 : index
    %107 = vector.load %arg2[%c1, %c0_46, %c0_47] : memref<3x64x128xf32, #tpu.memory_space<vmem>>, vector<1x64x128xf32>
    %108 = vector.shape_cast %107 : vector<1x64x128xf32> to vector<64x128xf32>
    %cst_48 = arith.constant dense<0.000000e+00> : vector<16x128xf32>
    %109 = tpu.matmul %106, %108, %cst_48 {dimension_numbers = #tpu.dot_dimension_numbers<[1], [0], [0], [1], [0, 0, 1, 1], [], []>} : vector<16x64xf32>, vector<64x128xf32>, vector<16x128xf32> -> vector<16x128xf32>
    %110 = arith.addf %105, %109 : vector<16x128xf32>
    %cst_49 = arith.constant dense<0.000000e+00> : vector<16x64xf32>
    %111 = tpu.matmul %25, %99, %cst_49 {dimension_numbers = #tpu.dot_dimension_numbers<[1], [0], [0], [1], [0, 0, 1, 1], [], []>} : vector<16x16xf32>, vector<16x64xf32>, vector<16x64xf32> -> vector<16x64xf32>
    %c2 = arith.constant 2 : index
    %c0_50 = arith.constant 0 : index
    %c0_51 = arith.constant 0 : index
    %112 = vector.load %arg2[%c2, %c0_50, %c0_51] : memref<3x64x128xf32, #tpu.memory_space<vmem>>, vector<1x64x128xf32>
    %113 = vector.shape_cast %112 : vector<1x64x128xf32> to vector<64x128xf32>
    %cst_52 = arith.constant dense<0.000000e+00> : vector<16x128xf32>
    %114 = tpu.matmul %111, %113, %cst_52 {dimension_numbers = #tpu.dot_dimension_numbers<[1], [0], [0], [1], [0, 0, 1, 1], [], []>} : vector<16x64xf32>, vector<64x128xf32>, vector<16x128xf32> -> vector<16x128xf32>
    %115 = arith.addf %110, %114 : vector<16x128xf32>
    %cst_53 = arith.constant dense<0.000000e+00> : vector<128xf32>
    %116 = vector.multi_reduction <add>, %115, %cst_53 [0] : vector<16x128xf32> to vector<128xf32>
    %117 = vector.shape_cast %116 : vector<128xf32> to vector<1x128xf32>
    %118 = arith.mulf %115, %115 : vector<16x128xf32>
    %cst_54 = arith.constant dense<0.000000e+00> : vector<128xf32>
    %119 = vector.multi_reduction <add>, %118, %cst_54 [0] : vector<16x128xf32> to vector<128xf32>
    %120 = vector.shape_cast %119 : vector<128xf32> to vector<1x128xf32>
    %cst_55 = arith.constant dense<0.000000e+00> : vector<1x128xf32>
    %121 = tpu.matmul %117, %35, %cst_55 {dimension_numbers = #tpu.dot_dimension_numbers<[1], [0], [0], [1], [0, 0, 1, 1], [], []>} : vector<1x128xf32>, vector<128x128xf32>, vector<1x128xf32> -> vector<1x128xf32>
    %cst_56 = arith.constant 3.906250e-03 : f32
    %122 = vector.broadcast %cst_56 : f32 to vector<1x128xf32>
    %123 = arith.mulf %121, %122 : vector<1x128xf32>
    %cst_57 = arith.constant dense<0.000000e+00> : vector<1x128xf32>
    %124 = tpu.matmul %120, %35, %cst_57 {dimension_numbers = #tpu.dot_dimension_numbers<[1], [0], [0], [1], [0, 0, 1, 1], [], []>} : vector<1x128xf32>, vector<128x128xf32>, vector<1x128xf32> -> vector<1x128xf32>
    %cst_58 = arith.constant 3.906250e-03 : f32
    %125 = vector.broadcast %cst_58 : f32 to vector<1x128xf32>
    %126 = arith.mulf %124, %125 : vector<1x128xf32>
    %127 = arith.mulf %123, %123 : vector<1x128xf32>
    %128 = arith.subf %126, %127 : vector<1x128xf32>
    %c0_59 = arith.constant 0 : index
    %c0_60 = arith.constant 0 : index
    %129 = vector.load %arg3[%c0_59, %c0_60] : memref<2x128xf32, #tpu.memory_space<vmem>>, vector<1x128xf32>
    %cst_61 = arith.constant 9.99999974E-6 : f32
    %130 = vector.broadcast %cst_61 : f32 to vector<1x128xf32>
    %131 = arith.addf %128, %130 : vector<1x128xf32>
    %132 = math.rsqrt %131 : vector<1x128xf32>
    %133 = arith.mulf %129, %132 : vector<1x128xf32>
    %c1_62 = arith.constant 1 : index
    %c0_63 = arith.constant 0 : index
    %134 = vector.load %arg3[%c1_62, %c0_63] : memref<2x128xf32, #tpu.memory_space<vmem>>, vector<1x128xf32>
    %135 = arith.mulf %123, %133 : vector<1x128xf32>
    %136 = arith.subf %134, %135 : vector<1x128xf32>
    %137 = vector.broadcast %133 : vector<1x128xf32> to vector<16x128xf32>
    %138 = arith.mulf %115, %137 : vector<16x128xf32>
    %139 = vector.broadcast %136 : vector<1x128xf32> to vector<16x128xf32>
    %140 = arith.addf %138, %139 : vector<16x128xf32>
    %cst_64 = arith.constant 0.00999999977 : f32
    %141 = vector.broadcast %cst_64 : f32 to vector<16x128xf32>
    %142 = arith.mulf %141, %140 : vector<16x128xf32>
    %143 = arith.maximumf %140, %142 : vector<16x128xf32>
    %cst_65 = arith.constant 0.000000e+00 : f32
    %144 = vector.broadcast %cst_65 : f32 to vector<16x128xf32>
    %cst_66 = arith.constant dense<0.000000e+00> : vector<16x128xf32>
    %145 = tpu.matmul %9, %143, %cst_66 {dimension_numbers = #tpu.dot_dimension_numbers<[1], [0], [0], [1], [0, 0, 1, 1], [], []>} : vector<16x16xf32>, vector<16x128xf32>, vector<16x128xf32> -> vector<16x128xf32>
    %c0_67 = arith.constant 0 : index
    %c0_68 = arith.constant 0 : index
    %c0_69 = arith.constant 0 : index
    %146 = vector.load %arg4[%c0_67, %c0_68, %c0_69] : memref<3x128x128xf32, #tpu.memory_space<vmem>>, vector<1x128x128xf32>
    %147 = vector.shape_cast %146 : vector<1x128x128xf32> to vector<128x128xf32>
    %cst_70 = arith.constant dense<0.000000e+00> : vector<16x128xf32>
    %148 = tpu.matmul %145, %147, %cst_70 {dimension_numbers = #tpu.dot_dimension_numbers<[1], [0], [0], [1], [0, 0, 1, 1], [], []>} : vector<16x128xf32>, vector<128x128xf32>, vector<16x128xf32> -> vector<16x128xf32>
    %149 = arith.addf %144, %148 : vector<16x128xf32>
    %cst_71 = arith.constant dense<0.000000e+00> : vector<16x128xf32>
    %150 = tpu.matmul %17, %143, %cst_71 {dimension_numbers = #tpu.dot_dimension_numbers<[1], [0], [0], [1], [0, 0, 1, 1], [], []>} : vector<16x16xf32>, vector<16x128xf32>, vector<16x128xf32> -> vector<16x128xf32>
    %c1_72 = arith.constant 1 : index
    %c0_73 = arith.constant 0 : index
    %c0_74 = arith.constant 0 : index
    %151 = vector.load %arg4[%c1_72, %c0_73, %c0_74] : memref<3x128x128xf32, #tpu.memory_space<vmem>>, vector<1x128x128xf32>
    %152 = vector.shape_cast %151 : vector<1x128x128xf32> to vector<128x128xf32>
    %cst_75 = arith.constant dense<0.000000e+00> : vector<16x128xf32>
    %153 = tpu.matmul %150, %152, %cst_75 {dimension_numbers = #tpu.dot_dimension_numbers<[1], [0], [0], [1], [0, 0, 1, 1], [], []>} : vector<16x128xf32>, vector<128x128xf32>, vector<16x128xf32> -> vector<16x128xf32>
    %154 = arith.addf %149, %153 : vector<16x128xf32>
    %cst_76 = arith.constant dense<0.000000e+00> : vector<16x128xf32>
    %155 = tpu.matmul %25, %143, %cst_76 {dimension_numbers = #tpu.dot_dimension_numbers<[1], [0], [0], [1], [0, 0, 1, 1], [], []>} : vector<16x16xf32>, vector<16x128xf32>, vector<16x128xf32> -> vector<16x128xf32>
    %c2_77 = arith.constant 2 : index
    %c0_78 = arith.constant 0 : index
    %c0_79 = arith.constant 0 : index
    %156 = vector.load %arg4[%c2_77, %c0_78, %c0_79] : memref<3x128x128xf32, #tpu.memory_space<vmem>>, vector<1x128x128xf32>
    %157 = vector.shape_cast %156 : vector<1x128x128xf32> to vector<128x128xf32>
    %cst_80 = arith.constant dense<0.000000e+00> : vector<16x128xf32>
    %158 = tpu.matmul %155, %157, %cst_80 {dimension_numbers = #tpu.dot_dimension_numbers<[1], [0], [0], [1], [0, 0, 1, 1], [], []>} : vector<16x128xf32>, vector<128x128xf32>, vector<16x128xf32> -> vector<16x128xf32>
    %159 = arith.addf %154, %158 : vector<16x128xf32>
    %cst_81 = arith.constant dense<0.000000e+00> : vector<128xf32>
    %160 = vector.multi_reduction <add>, %159, %cst_81 [0] : vector<16x128xf32> to vector<128xf32>
    %161 = vector.shape_cast %160 : vector<128xf32> to vector<1x128xf32>
    %162 = arith.mulf %159, %159 : vector<16x128xf32>
    %cst_82 = arith.constant dense<0.000000e+00> : vector<128xf32>
    %163 = vector.multi_reduction <add>, %162, %cst_82 [0] : vector<16x128xf32> to vector<128xf32>
    %164 = vector.shape_cast %163 : vector<128xf32> to vector<1x128xf32>
    %cst_83 = arith.constant dense<0.000000e+00> : vector<1x128xf32>
    %165 = tpu.matmul %161, %35, %cst_83 {dimension_numbers = #tpu.dot_dimension_numbers<[1], [0], [0], [1], [0, 0, 1, 1], [], []>} : vector<1x128xf32>, vector<128x128xf32>, vector<1x128xf32> -> vector<1x128xf32>
    %cst_84 = arith.constant 3.906250e-03 : f32
    %166 = vector.broadcast %cst_84 : f32 to vector<1x128xf32>
    %167 = arith.mulf %165, %166 : vector<1x128xf32>
    %cst_85 = arith.constant dense<0.000000e+00> : vector<1x128xf32>
    %168 = tpu.matmul %164, %35, %cst_85 {dimension_numbers = #tpu.dot_dimension_numbers<[1], [0], [0], [1], [0, 0, 1, 1], [], []>} : vector<1x128xf32>, vector<128x128xf32>, vector<1x128xf32> -> vector<1x128xf32>
    %cst_86 = arith.constant 3.906250e-03 : f32
    %169 = vector.broadcast %cst_86 : f32 to vector<1x128xf32>
    %170 = arith.mulf %168, %169 : vector<1x128xf32>
    %171 = arith.mulf %167, %167 : vector<1x128xf32>
    %172 = arith.subf %170, %171 : vector<1x128xf32>
    %c0_87 = arith.constant 0 : index
    %c0_88 = arith.constant 0 : index
    %173 = vector.load %arg5[%c0_87, %c0_88] : memref<2x128xf32, #tpu.memory_space<vmem>>, vector<1x128xf32>
    %cst_89 = arith.constant 9.99999974E-6 : f32
    %174 = vector.broadcast %cst_89 : f32 to vector<1x128xf32>
    %175 = arith.addf %172, %174 : vector<1x128xf32>
    %176 = math.rsqrt %175 : vector<1x128xf32>
    %177 = arith.mulf %173, %176 : vector<1x128xf32>
    %c1_90 = arith.constant 1 : index
    %c0_91 = arith.constant 0 : index
    %178 = vector.load %arg5[%c1_90, %c0_91] : memref<2x128xf32, #tpu.memory_space<vmem>>, vector<1x128xf32>
    %179 = arith.mulf %167, %177 : vector<1x128xf32>
    %180 = arith.subf %178, %179 : vector<1x128xf32>
    %181 = vector.broadcast %177 : vector<1x128xf32> to vector<16x128xf32>
    %182 = arith.mulf %159, %181 : vector<16x128xf32>
    %183 = vector.broadcast %180 : vector<1x128xf32> to vector<16x128xf32>
    %184 = arith.addf %182, %183 : vector<16x128xf32>
    %cst_92 = arith.constant 0.00999999977 : f32
    %185 = vector.broadcast %cst_92 : f32 to vector<16x128xf32>
    %186 = arith.mulf %185, %184 : vector<16x128xf32>
    %187 = arith.maximumf %184, %186 : vector<16x128xf32>
    %cst_93 = arith.constant 0.000000e+00 : f32
    %188 = vector.broadcast %cst_93 : f32 to vector<8x128xf32>
    %cst_94 = arith.constant dense<0.000000e+00> : vector<8x128xf32>
    %189 = tpu.matmul %45, %187, %cst_94 {dimension_numbers = #tpu.dot_dimension_numbers<[1], [0], [0], [1], [0, 0, 1, 1], [], []>} : vector<8x16xf32>, vector<16x128xf32>, vector<8x128xf32> -> vector<8x128xf32>
    %c0_95 = arith.constant 0 : index
    %c0_96 = arith.constant 0 : index
    %c0_97 = arith.constant 0 : index
    %190 = vector.load %arg6[%c0_95, %c0_96, %c0_97] : memref<3x128x128xf32, #tpu.memory_space<vmem>>, vector<1x128x128xf32>
    %191 = vector.shape_cast %190 : vector<1x128x128xf32> to vector<128x128xf32>
    %cst_98 = arith.constant dense<0.000000e+00> : vector<8x128xf32>
    %192 = tpu.matmul %189, %191, %cst_98 {dimension_numbers = #tpu.dot_dimension_numbers<[1], [0], [0], [1], [0, 0, 1, 1], [], []>} : vector<8x128xf32>, vector<128x128xf32>, vector<8x128xf32> -> vector<8x128xf32>
    %193 = arith.addf %188, %192 : vector<8x128xf32>
    %cst_99 = arith.constant dense<0.000000e+00> : vector<8x128xf32>
    %194 = tpu.matmul %53, %187, %cst_99 {dimension_numbers = #tpu.dot_dimension_numbers<[1], [0], [0], [1], [0, 0, 1, 1], [], []>} : vector<8x16xf32>, vector<16x128xf32>, vector<8x128xf32> -> vector<8x128xf32>
    %c1_100 = arith.constant 1 : index
    %c0_101 = arith.constant 0 : index
    %c0_102 = arith.constant 0 : index
    %195 = vector.load %arg6[%c1_100, %c0_101, %c0_102] : memref<3x128x128xf32, #tpu.memory_space<vmem>>, vector<1x128x128xf32>
    %196 = vector.shape_cast %195 : vector<1x128x128xf32> to vector<128x128xf32>
    %cst_103 = arith.constant dense<0.000000e+00> : vector<8x128xf32>
    %197 = tpu.matmul %194, %196, %cst_103 {dimension_numbers = #tpu.dot_dimension_numbers<[1], [0], [0], [1], [0, 0, 1, 1], [], []>} : vector<8x128xf32>, vector<128x128xf32>, vector<8x128xf32> -> vector<8x128xf32>
    %198 = arith.addf %193, %197 : vector<8x128xf32>
    %cst_104 = arith.constant dense<0.000000e+00> : vector<8x128xf32>
    %199 = tpu.matmul %61, %187, %cst_104 {dimension_numbers = #tpu.dot_dimension_numbers<[1], [0], [0], [1], [0, 0, 1, 1], [], []>} : vector<8x16xf32>, vector<16x128xf32>, vector<8x128xf32> -> vector<8x128xf32>
    %c2_105 = arith.constant 2 : index
    %c0_106 = arith.constant 0 : index
    %c0_107 = arith.constant 0 : index
    %200 = vector.load %arg6[%c2_105, %c0_106, %c0_107] : memref<3x128x128xf32, #tpu.memory_space<vmem>>, vector<1x128x128xf32>
    %201 = vector.shape_cast %200 : vector<1x128x128xf32> to vector<128x128xf32>
    %cst_108 = arith.constant dense<0.000000e+00> : vector<8x128xf32>
    %202 = tpu.matmul %199, %201, %cst_108 {dimension_numbers = #tpu.dot_dimension_numbers<[1], [0], [0], [1], [0, 0, 1, 1], [], []>} : vector<8x128xf32>, vector<128x128xf32>, vector<8x128xf32> -> vector<8x128xf32>
    %203 = arith.addf %198, %202 : vector<8x128xf32>
    %cst_109 = arith.constant dense<0.000000e+00> : vector<128xf32>
    %204 = vector.multi_reduction <add>, %203, %cst_109 [0] : vector<8x128xf32> to vector<128xf32>
    %205 = vector.shape_cast %204 : vector<128xf32> to vector<1x128xf32>
    %206 = arith.mulf %203, %203 : vector<8x128xf32>
    %cst_110 = arith.constant dense<0.000000e+00> : vector<128xf32>
    %207 = vector.multi_reduction <add>, %206, %cst_110 [0] : vector<8x128xf32> to vector<128xf32>
    %208 = vector.shape_cast %207 : vector<128xf32> to vector<1x128xf32>
    %cst_111 = arith.constant dense<0.000000e+00> : vector<1x128xf32>
    %209 = tpu.matmul %205, %71, %cst_111 {dimension_numbers = #tpu.dot_dimension_numbers<[1], [0], [0], [1], [0, 0, 1, 1], [], []>} : vector<1x128xf32>, vector<128x128xf32>, vector<1x128xf32> -> vector<1x128xf32>
    %cst_112 = arith.constant 1.562500e-02 : f32
    %210 = vector.broadcast %cst_112 : f32 to vector<1x128xf32>
    %211 = arith.mulf %209, %210 : vector<1x128xf32>
    %cst_113 = arith.constant dense<0.000000e+00> : vector<1x128xf32>
    %212 = tpu.matmul %208, %71, %cst_113 {dimension_numbers = #tpu.dot_dimension_numbers<[1], [0], [0], [1], [0, 0, 1, 1], [], []>} : vector<1x128xf32>, vector<128x128xf32>, vector<1x128xf32> -> vector<1x128xf32>
    %cst_114 = arith.constant 1.562500e-02 : f32
    %213 = vector.broadcast %cst_114 : f32 to vector<1x128xf32>
    %214 = arith.mulf %212, %213 : vector<1x128xf32>
    %215 = arith.mulf %211, %211 : vector<1x128xf32>
    %216 = arith.subf %214, %215 : vector<1x128xf32>
    %c0_115 = arith.constant 0 : index
    %c0_116 = arith.constant 0 : index
    %217 = vector.load %arg7[%c0_115, %c0_116] : memref<2x128xf32, #tpu.memory_space<vmem>>, vector<1x128xf32>
    %cst_117 = arith.constant 9.99999974E-6 : f32
    %218 = vector.broadcast %cst_117 : f32 to vector<1x128xf32>
    %219 = arith.addf %216, %218 : vector<1x128xf32>
    %220 = math.rsqrt %219 : vector<1x128xf32>
    %221 = arith.mulf %217, %220 : vector<1x128xf32>
    %c1_118 = arith.constant 1 : index
    %c0_119 = arith.constant 0 : index
    %222 = vector.load %arg7[%c1_118, %c0_119] : memref<2x128xf32, #tpu.memory_space<vmem>>, vector<1x128xf32>
    %223 = arith.mulf %211, %221 : vector<1x128xf32>
    %224 = arith.subf %222, %223 : vector<1x128xf32>
    %225 = vector.broadcast %221 : vector<1x128xf32> to vector<8x128xf32>
    %226 = arith.mulf %203, %225 : vector<8x128xf32>
    %227 = vector.broadcast %224 : vector<1x128xf32> to vector<8x128xf32>
    %228 = arith.addf %226, %227 : vector<8x128xf32>
    %cst_120 = arith.constant 0.00999999977 : f32
    %229 = vector.broadcast %cst_120 : f32 to vector<8x128xf32>
    %230 = arith.mulf %229, %228 : vector<8x128xf32>
    %231 = arith.maximumf %228, %230 : vector<8x128xf32>
    %cst_121 = arith.constant 0.000000e+00 : f32
    %232 = vector.broadcast %cst_121 : f32 to vector<8x128xf32>
    %cst_122 = arith.constant dense<0.000000e+00> : vector<8x128xf32>
    %233 = tpu.matmul %81, %231, %cst_122 {dimension_numbers = #tpu.dot_dimension_numbers<[1], [0], [0], [1], [0, 0, 1, 1], [], []>} : vector<8x8xf32>, vector<8x128xf32>, vector<8x128xf32> -> vector<8x128xf32>
    %c0_123 = arith.constant 0 : index
    %c0_124 = arith.constant 0 : index
    %c0_125 = arith.constant 0 : index
    %234 = vector.load %arg8[%c0_123, %c0_124, %c0_125] : memref<3x128x128xf32, #tpu.memory_space<vmem>>, vector<1x128x128xf32>
    %235 = vector.shape_cast %234 : vector<1x128x128xf32> to vector<128x128xf32>
    %cst_126 = arith.constant dense<0.000000e+00> : vector<8x128xf32>
    %236 = tpu.matmul %233, %235, %cst_126 {dimension_numbers = #tpu.dot_dimension_numbers<[1], [0], [0], [1], [0, 0, 1, 1], [], []>} : vector<8x128xf32>, vector<128x128xf32>, vector<8x128xf32> -> vector<8x128xf32>
    %237 = arith.addf %232, %236 : vector<8x128xf32>
    %cst_127 = arith.constant dense<0.000000e+00> : vector<8x128xf32>
    %238 = tpu.matmul %89, %231, %cst_127 {dimension_numbers = #tpu.dot_dimension_numbers<[1], [0], [0], [1], [0, 0, 1, 1], [], []>} : vector<8x8xf32>, vector<8x128xf32>, vector<8x128xf32> -> vector<8x128xf32>
    %c1_128 = arith.constant 1 : index
    %c0_129 = arith.constant 0 : index
    %c0_130 = arith.constant 0 : index
    %239 = vector.load %arg8[%c1_128, %c0_129, %c0_130] : memref<3x128x128xf32, #tpu.memory_space<vmem>>, vector<1x128x128xf32>
    %240 = vector.shape_cast %239 : vector<1x128x128xf32> to vector<128x128xf32>
    %cst_131 = arith.constant dense<0.000000e+00> : vector<8x128xf32>
    %241 = tpu.matmul %238, %240, %cst_131 {dimension_numbers = #tpu.dot_dimension_numbers<[1], [0], [0], [1], [0, 0, 1, 1], [], []>} : vector<8x128xf32>, vector<128x128xf32>, vector<8x128xf32> -> vector<8x128xf32>
    %242 = arith.addf %237, %241 : vector<8x128xf32>
    %cst_132 = arith.constant dense<0.000000e+00> : vector<8x128xf32>
    %243 = tpu.matmul %97, %231, %cst_132 {dimension_numbers = #tpu.dot_dimension_numbers<[1], [0], [0], [1], [0, 0, 1, 1], [], []>} : vector<8x8xf32>, vector<8x128xf32>, vector<8x128xf32> -> vector<8x128xf32>
    %c2_133 = arith.constant 2 : index
    %c0_134 = arith.constant 0 : index
    %c0_135 = arith.constant 0 : index
    %244 = vector.load %arg8[%c2_133, %c0_134, %c0_135] : memref<3x128x128xf32, #tpu.memory_space<vmem>>, vector<1x128x128xf32>
    %245 = vector.shape_cast %244 : vector<1x128x128xf32> to vector<128x128xf32>
    %cst_136 = arith.constant dense<0.000000e+00> : vector<8x128xf32>
    %246 = tpu.matmul %243, %245, %cst_136 {dimension_numbers = #tpu.dot_dimension_numbers<[1], [0], [0], [1], [0, 0, 1, 1], [], []>} : vector<8x128xf32>, vector<128x128xf32>, vector<8x128xf32> -> vector<8x128xf32>
    %247 = arith.addf %242, %246 : vector<8x128xf32>
    %cst_137 = arith.constant dense<0.000000e+00> : vector<128xf32>
    %248 = vector.multi_reduction <add>, %247, %cst_137 [0] : vector<8x128xf32> to vector<128xf32>
    %249 = vector.shape_cast %248 : vector<128xf32> to vector<1x128xf32>
    %250 = arith.mulf %247, %247 : vector<8x128xf32>
    %cst_138 = arith.constant dense<0.000000e+00> : vector<128xf32>
    %251 = vector.multi_reduction <add>, %250, %cst_138 [0] : vector<8x128xf32> to vector<128xf32>
    %252 = vector.shape_cast %251 : vector<128xf32> to vector<1x128xf32>
    %cst_139 = arith.constant dense<0.000000e+00> : vector<1x128xf32>
    %253 = tpu.matmul %249, %71, %cst_139 {dimension_numbers = #tpu.dot_dimension_numbers<[1], [0], [0], [1], [0, 0, 1, 1], [], []>} : vector<1x128xf32>, vector<128x128xf32>, vector<1x128xf32> -> vector<1x128xf32>
    %cst_140 = arith.constant 1.562500e-02 : f32
    %254 = vector.broadcast %cst_140 : f32 to vector<1x128xf32>
    %255 = arith.mulf %253, %254 : vector<1x128xf32>
    %cst_141 = arith.constant dense<0.000000e+00> : vector<1x128xf32>
    %256 = tpu.matmul %252, %71, %cst_141 {dimension_numbers = #tpu.dot_dimension_numbers<[1], [0], [0], [1], [0, 0, 1, 1], [], []>} : vector<1x128xf32>, vector<128x128xf32>, vector<1x128xf32> -> vector<1x128xf32>
    %cst_142 = arith.constant 1.562500e-02 : f32
    %257 = vector.broadcast %cst_142 : f32 to vector<1x128xf32>
    %258 = arith.mulf %256, %257 : vector<1x128xf32>
    %259 = arith.mulf %255, %255 : vector<1x128xf32>
    %260 = arith.subf %258, %259 : vector<1x128xf32>
    %c0_143 = arith.constant 0 : index
    %c0_144 = arith.constant 0 : index
    %261 = vector.load %arg9[%c0_143, %c0_144] : memref<2x128xf32, #tpu.memory_space<vmem>>, vector<1x128xf32>
    %cst_145 = arith.constant 9.99999974E-6 : f32
    %262 = vector.broadcast %cst_145 : f32 to vector<1x128xf32>
    %263 = arith.addf %260, %262 : vector<1x128xf32>
    %264 = math.rsqrt %263 : vector<1x128xf32>
    %265 = arith.mulf %261, %264 : vector<1x128xf32>
    %c1_146 = arith.constant 1 : index
    %c0_147 = arith.constant 0 : index
    %266 = vector.load %arg9[%c1_146, %c0_147] : memref<2x128xf32, #tpu.memory_space<vmem>>, vector<1x128xf32>
    %267 = arith.mulf %255, %265 : vector<1x128xf32>
    %268 = arith.subf %266, %267 : vector<1x128xf32>
    %269 = vector.broadcast %265 : vector<1x128xf32> to vector<8x128xf32>
    %270 = arith.mulf %247, %269 : vector<8x128xf32>
    %271 = vector.broadcast %268 : vector<1x128xf32> to vector<8x128xf32>
    %272 = arith.addf %270, %271 : vector<8x128xf32>
    %cst_148 = arith.constant 0.00999999977 : f32
    %273 = vector.broadcast %cst_148 : f32 to vector<8x128xf32>
    %274 = arith.mulf %273, %272 : vector<8x128xf32>
    %275 = arith.maximumf %272, %274 : vector<8x128xf32>
    %c0_149 = arith.constant 0 : index
    %c0_150 = arith.constant 0 : index
    %c0_151 = arith.constant 0 : index
    %276 = vector.load %arg10[%c0_149, %c0_150, %c0_151] : memref<1x8x128xf32, #tpu.memory_space<vmem>>, vector<1x8x128xf32>
    %277 = vector.shape_cast %276 : vector<1x8x128xf32> to vector<8x128xf32>
    %278 = vector.shape_cast %275 : vector<8x128xf32> to vector<1x8x128xf32>
    tpu.vector_store %arg10[%c0_149, %c0_150, %c0_151], %278 {strides = array<i32>} : memref<1x8x128xf32, #tpu.memory_space<vmem>>, vector<1x8x128xf32>,
    return
  }
  func.func @transform_0(%arg0: i32) -> (i32, i32, i32) {
    %c0_i32 = arith.constant 0 : i32
    %c0_i32_0 = arith.constant 0 : i32
    %c0_i32_1 = arith.constant 0 : i32
    return %arg0, %c0_i32, %c0_i32_0 : i32, i32, i32
  }
  func.func @transform_1(%arg0: i32) -> (i32, i32, i32) {
    %c0_i32 = arith.constant 0 : i32
    %c0_i32_0 = arith.constant 0 : i32
    %c0_i32_1 = arith.constant 0 : i32
    %c0_i32_2 = arith.constant 0 : i32
    return %c0_i32, %c0_i32_0, %c0_i32_1 : i32, i32, i32
  }
  func.func @transform_2(%arg0: i32) -> (i32, i32) {
    %c0_i32 = arith.constant 0 : i32
    %c0_i32_0 = arith.constant 0 : i32
    %c0_i32_1 = arith.constant 0 : i32
    return %c0_i32, %c0_i32_0 : i32, i32
  }
  func.func @transform_3(%arg0: i32) -> (i32, i32, i32) {
    %c0_i32 = arith.constant 0 : i32
    %c0_i32_0 = arith.constant 0 : i32
    %c0_i32_1 = arith.constant 0 : i32
    %c0_i32_2 = arith.constant 0 : i32
    return %c0_i32, %c0_i32_0, %c0_i32_1 : i32, i32, i32
  }
  func.func @transform_4(%arg0: i32) -> (i32, i32) {
    %c0_i32 = arith.constant 0 : i32
    %c0_i32_0 = arith.constant 0 : i32
    %c0_i32_1 = arith.constant 0 : i32
    return %c0_i32, %c0_i32_0 : i32, i32
  }
  func.func @transform_5(%arg0: i32) -> (i32, i32, i32) {
    %c0_i32 = arith.constant 0 : i32
    %c0_i32_0 = arith.constant 0 : i32
    %c0_i32_1 = arith.constant 0 : i32
    %c0_i32_2 = arith.constant 0 : i32
    return %c0_i32, %c0_i32_0, %c0_i32_1 : i32, i32, i32
  }
  func.func @transform_6(%arg0: i32) -> (i32, i32) {
    %c0_i32 = arith.constant 0 : i32
    %c0_i32_0 = arith.constant 0 : i32
    %c0_i32_1 = arith.constant 0 : i32
    return %c0_i32, %c0_i32_0 : i32, i32
  }
  func.func @transform_7(%arg0: i32) -> (i32, i32, i32) {
    %c0_i32 = arith.constant 0 : i32
    %c0_i32_0 = arith.constant 0 : i32
    %c0_i32_1 = arith.constant 0 : i32
    %c0_i32_2 = arith.constant 0 : i32
    return %c0_i32, %c0_i32_0, %c0_i32_1 : i32, i32, i32
  }
  func.func @transform_8(%arg0: i32) -> (i32, i32) {
    %c0_i32 = arith.constant 0 : i32
    %c0_i32_0 = arith.constant 0 : i32
    %c0_i32_1 = arith.constant 0 : i32
    return %c0_i32, %c0_i32_0 : i32, i32
  }
  func.func @transform_9(%arg0: i32) -> (i32, i32, i32) {
    %c0_i32 = arith.constant 0 : i32
    %c0_i32_0 = arith.constant 0 : i32
    %c0_i32_1 = arith.constant 0 : i32
    return %arg0, %c0_i32, %c0_i32_0 : i32, i32, i32
  }
}

</mosaic_0001>

<bundles_post_ra>
// kernel: tile.39
= control target key start
LH: loop header
LB: loop body
LE: loop exit
PB: predicated region body
PF: predicated region fallthrough
CT: control target
= control target key end

     0   :  { %s131_s10 = smov 120   ;;  %s132_s11 = smov 104   ;;  %vm3_vm0 = vcmask 64512   ;;  %vm9_vm1 = vcmask 1048512   ;;  %vm15_vm2 = vcmask 982912   ;;  %vm21_vm3 = vcmask 917312   ;;  %s207_s0 = inlined_call_operand.vmem [shape: f32[16,8], index: 0, kind: input, shape index: {}]   ;;  %s208_s1 = inlined_call_operand.vmem [shape: f32[1,128], index: 1, kind: output, shape index: {}]  }
   0x1   :  { %v101_v0 = vld [vmem:[%s207_s0 + $0xf] sm:$0x1]   ;;  %v103_v1 = vld [vmem:[%s207_s0 + $0xd] sm:$0x1]   ;;  %v102_v2 = vld [vmem:[%s207_s0 + $0xe] sm:$0x1]  }
   0x2   :  { %7 = vrot.lane.b32.xlu0 %v101_v0, %s131_s10  ;;  %19 = vrot.lane.b32.xlu1 %v103_v1, %s132_s11  ;;  %v104_v3 = vld [vmem:[%s207_s0 + $0xc] sm:$0x1]   ;;  %s133_s16 = smov 112   ;;  %s134_s17 = smov 96   ;;  %v105_v4 = vld [vmem:[%s207_s0 + $0xb] sm:$0x1]  }
   0x3   :  { %v106_v5 = vld [vmem:[%s207_s0 + $0xa] sm:$0x1]   ;;  %v2_v6 = vld [vmem:[%s207_s0] sm:$0x1]   ;;  %s135_s24 = smov 88   ;;  %s136_s25 = smov 80  }
   0x4   :  { %4 = vst.msk [vmem:[#allocation0] sm:$0x1] %vm3_vm0, %v2_v6   ;;  %v107_v7 = vld [vmem:[%s207_s0 + $0x9] sm:$0x1]   ;;  %v108_v8 = vld [vmem:[%s207_s0 + $0x8] sm:$0x1]  }
   0x5   :  { %s137_s30 = smov 72   ;;  %s138_s2 = smov 64   ;;  %v109_v9 = vld [vmem:[%s207_s0 + $0x7] sm:$0x1]   ;;  %v110_v10 = vld [vmem:[%s207_s0 + $0x6] sm:$0x1]  }
   0x6   :  { %13 = vrot.lane.b32.xlu0 %v102_v2, %s133_s16  ;;  %25 = vrot.lane.b32.xlu1 %v104_v3, %s134_s17  ;;  %s139_s7 = smov 56   ;;  %s140_s8 = smov 48   ;;  %v111_v11 = vld [vmem:[%s207_s0 + $0x5] sm:$0x1]   ;;  %v112_v12 = vld [vmem:[%s207_s0 + $0x4] sm:$0x1]  }
   0x7   :  { %s141_s13 = smov 40   ;;  %s142_s14 = smov 32   ;;  %v113_v13 = vld [vmem:[%s207_s0 + $0x3] sm:$0x1]   ;;  %v114_v14 = vld [vmem:[%s207_s0 + $0x2] sm:$0x1]  }
   0x8   :  { %s143_s19 = smov 24   ;;  %s144_s20 = smov 16   ;;  %v115_v15 = vld [vmem:[%s207_s0 + $0x1] sm:$0x1]   ;;  %vm27_vm4 = vcmask 851712   ;;  %vm33_vm5 = vcmask 786112  }
   0x9   :  { %s145_s0 = smov 8   ;;  %vm39_vm6 = vcmask 720512   ;;  %vm45_vm7 = vcmask 654912   ;;  %vm51_vm8 = vcmask 589312   ;;  %vm57_vm9 = vcmask 523712  }
   0xa   :  { %31 = vrot.lane.b32.xlu0 %v105_v4, %s135_s24  ;;  %37 = vrot.lane.b32.xlu1 %v106_v5, %s136_s25  ;;  %vm63_vm10 = vcmask 458112   ;;  %vm69_vm11 = vcmask 392512   ;;  %vm75_vm12 = vcmask 326912   ;;  %vm81_vm13 = vcmask 261312  }
   0xb   :  { %vm87_vm14 = vcmask 195712   ;;  %vm93_vm15 = vcmask 130112  }
   0xe   :  { %43 = vrot.lane.b32.xlu0 %v107_v7, %s137_s30  ;;  %49 = vrot.lane.b32.xlu1 %v108_v8, %s138_s2 }
  0x12   :  { %55 = vrot.lane.b32.xlu0 %v109_v9, %s139_s7  ;;  %61 = vrot.lane.b32.xlu1 %v110_v10, %s140_s8 }
  0x16   :  { %67 = vrot.lane.b32.xlu0 %v111_v11, %s141_s13  ;;  %73 = vrot.lane.b32.xlu1 %v112_v12, %s142_s14 }
  0x1a   :  { %79 = vrot.lane.b32.xlu0 %v113_v13, %s143_s19  ;;  %85 = vrot.lane.b32.xlu1 %v114_v14, %s144_s20 }
  0x1e   :  { %91 = vrot.lane.b32.xlu0 %v115_v15, %s145_s0 }
  0x74   :  { %v8_v16 = vpop.permute.xlu0 %7   ;;  %v20_v17 = vpop.permute.xlu1 %19  }
  0x75   :  { %10 = vst.msk [vmem:[#allocation0] sm:$0x1] %vm9_vm1, %v8_v16  }
  0x78   :  { %v14_v18 = vpop.permute.xlu0 %13   ;;  %v26_v19 = vpop.permute.xlu1 %25  }
  0x79   :  { %16 = vst.msk [vmem:[#allocation0] sm:$0x1] %vm15_vm2, %v14_v18  }
  0x7a   :  { %22 = vst.msk [vmem:[#allocation0] sm:$0x1] %vm21_vm3, %v20_v17  }
  0x7b   :  { %28 = vst.msk [vmem:[#allocation0] sm:$0x1] %vm27_vm4, %v26_v19  }
  0x7c   :  { %v32_v20 = vpop.permute.xlu0 %31   ;;  %v38_v21 = vpop.permute.xlu1 %37  }
  0x7d   :  { %34 = vst.msk [vmem:[#allocation0] sm:$0x1] %vm33_vm5, %v32_v20  }
  0x7e   :  { %40 = vst.msk [vmem:[#allocation0] sm:$0x1] %vm39_vm6, %v38_v21  }
  0x80   :  { %v44_v22 = vpop.permute.xlu0 %43   ;;  %v50_v23 = vpop.permute.xlu1 %49  }
  0x81   :  { %46 = vst.msk [vmem:[#allocation0] sm:$0x1] %vm45_vm7, %v44_v22  }
  0x82   :  { %52 = vst.msk [vmem:[#allocation0] sm:$0x1] %vm51_vm8, %v50_v23  }
  0x84   :  { %v56_v24 = vpop.permute.xlu0 %55   ;;  %v62_v25 = vpop.permute.xlu1 %61  }
  0x85   :  { %58 = vst.msk [vmem:[#allocation0] sm:$0x1] %vm57_vm9, %v56_v24  }
  0x86   :  { %64 = vst.msk [vmem:[#allocation0] sm:$0x1] %vm63_vm10, %v62_v25  }
  0x88   :  { %v68_v26 = vpop.permute.xlu0 %67   ;;  %v74_v27 = vpop.permute.xlu1 %73  }
  0x89   :  { %70 = vst.msk [vmem:[#allocation0] sm:$0x1] %vm69_vm11, %v68_v26  }
  0x8a   :  { %76 = vst.msk [vmem:[#allocation0] sm:$0x1] %vm75_vm12, %v74_v27  }
  0x8c   :  { %v80_v28 = vpop.permute.xlu0 %79   ;;  %v86_v29 = vpop.permute.xlu1 %85  }
  0x8d   :  { %82 = vst.msk [vmem:[#allocation0] sm:$0x1] %vm81_vm13, %v80_v28  }
  0x8e   :  { %88 = vst.msk [vmem:[#allocation0] sm:$0x1] %vm87_vm14, %v86_v29  }
  0x90   :  { %v92_v30 = vpop.permute.xlu0 %91  }
  0x91   :  { %94 = vst.msk [vmem:[#allocation0] sm:$0x1] %vm93_vm15, %v92_v30  }
  0x98   :  { %v98_v31 = vld [vmem:[#allocation0] sm:$0x1] }
  0x99   :  { %100 = vst [vmem:[%s208_s1] sm:$0x1] %v98_v31 }

// kernel: tile.38
= control target key start
LH: loop header
LB: loop body
LE: loop exit
PB: predicated region body
PF: predicated region fallthrough
CT: control target
= control target key end

     0   :  { %s28_s0 = inlined_call_operand.vmem [shape: f32[8], index: 0, kind: input, shape index: {}]   ;;  %s29_s1 = inlined_call_operand.vmem [shape: f32[16,8], index: 1, kind: output, shape index: {}]  }
   0x1   :  { %v4_v0 = vld [vmem:[%s28_s0] ss:$0 sm:$0xff] }
   0x2   :  { %5 = vst [vmem:[%s29_s1] sm:$0xff] %v4_v0  ;;  %8 = vst [vmem:[%s29_s1 + $0x8] sm:$0xff] %v4_v0 }

// kernel: tile.54
= control target key start
LH: loop header
LB: loop body
LE: loop exit
PB: predicated region body
PF: predicated region fallthrough
CT: control target
= control target key end

     0   :  { %s22_s0 = inlined_call_operand.vmem [shape: f32[16], index: 0, kind: input, shape index: {}]   ;;  %s23_s1 = inlined_call_operand.vmem [shape: f32[8,16], index: 1, kind: output, shape index: {}]  }
   0x1   :  { %v4_v0 = vld [vmem:[%s22_s0] ss:$0 sm:$0xff] }
   0x2   :  { %5 = vst [vmem:[%s23_s1] sm:$0xff] %v4_v0 }

// kernel: tile.55
= control target key start
LH: loop header
LB: loop body
LE: loop exit
PB: predicated region body
PF: predicated region fallthrough
CT: control target
= control target key end

     0   :  { %s67_s10 = smov 112   ;;  %s68_s11 = smov 80   ;;  %vm3_vm0 = vcmask 130048   ;;  %vm9_vm1 = vcmask 1048448   ;;  %vm15_vm2 = vcmask 917248   ;;  %vm21_vm3 = vcmask 786048   ;;  %s111_s0 = inlined_call_operand.vmem [shape: f32[8,16], index: 0, kind: input, shape index: {}]   ;;  %s112_s1 = inlined_call_operand.vmem [shape: f32[1,128], index: 1, kind: output, shape index: {}]  }
   0x1   :  { %v53_v0 = vld [vmem:[%s111_s0 + $0x7] sm:$0x1]   ;;  %v55_v1 = vld [vmem:[%s111_s0 + $0x5] sm:$0x1]   ;;  %v54_v2 = vld [vmem:[%s111_s0 + $0x6] sm:$0x1]  }
   0x2   :  { %7 = vrot.lane.b32.xlu0 %v53_v0, %s67_s10  ;;  %19 = vrot.lane.b32.xlu1 %v55_v1, %s68_s11  ;;  %v56_v3 = vld [vmem:[%s111_s0 + $0x4] sm:$0x1]   ;;  %v2_v4 = vld [vmem:[%s111_s0] sm:$0x1]   ;;  %s69_s18 = smov 96   ;;  %s70_s19 = smov 64  }
   0x3   :  { %4 = vst.msk [vmem:[#allocation0] sm:$0x1] %vm3_vm0, %v2_v4   ;;  %v57_v5 = vld [vmem:[%s111_s0 + $0x3] sm:$0x1]   ;;  %v58_v6 = vld [vmem:[%s111_s0 + $0x2] sm:$0x1]  }
   0x4   :  { %s71_s24 = smov 48   ;;  %s72_s25 = smov 32   ;;  %v59_v7 = vld [vmem:[%s111_s0 + $0x1] sm:$0x1]   ;;  %vm27_vm4 = vcmask 654848   ;;  %vm33_vm5 = vcmask 523648  }
   0x5   :  { %s73_s0 = smov 16   ;;  %vm39_vm6 = vcmask 392448   ;;  %vm45_vm7 = vcmask 261248  }
   0x6   :  { %13 = vrot.lane.b32.xlu0 %v54_v2, %s69_s18  ;;  %25 = vrot.lane.b32.xlu1 %v56_v3, %s70_s19 }
   0xa   :  { %31 = vrot.lane.b32.xlu0 %v57_v5, %s71_s24  ;;  %37 = vrot.lane.b32.xlu1 %v58_v6, %s72_s25 }
   0xe   :  { %43 = vrot.lane.b32.xlu0 %v59_v7, %s73_s0 }
  0x74   :  { %v8_v8 = vpop.permute.xlu0 %7   ;;  %v20_v9 = vpop.permute.xlu1 %19  }
  0x75   :  { %10 = vst.msk [vmem:[#allocation0] sm:$0x1] %vm9_vm1, %v8_v8  }
  0x78   :  { %v14_v10 = vpop.permute.xlu0 %13   ;;  %v26_v11 = vpop.permute.xlu1 %25  }
  0x79   :  { %16 = vst.msk [vmem:[#allocation0] sm:$0x1] %vm15_vm2, %v14_v10  }
  0x7a   :  { %22 = vst.msk [vmem:[#allocation0] sm:$0x1] %vm21_vm3, %v20_v9  }
  0x7b   :  { %28 = vst.msk [vmem:[#allocation0] sm:$0x1] %vm27_vm4, %v26_v11  }
  0x7c   :  { %v32_v12 = vpop.permute.xlu0 %31   ;;  %v38_v13 = vpop.permute.xlu1 %37  }
  0x7d   :  { %34 = vst.msk [vmem:[#allocation0] sm:$0x1] %vm33_vm5, %v32_v12  }
  0x7e   :  { %40 = vst.msk [vmem:[#allocation0] sm:$0x1] %vm39_vm6, %v38_v13  }
  0x80   :  { %v44_v14 = vpop.permute.xlu0 %43  }
  0x81   :  { %46 = vst.msk [vmem:[#allocation0] sm:$0x1] %vm45_vm7, %v44_v14  }
  0x88   :  { %v50_v15 = vld [vmem:[#allocation0] sm:$0x1] }
  0x89   :  { %52 = vst [vmem:[%s112_s1] sm:$0x1] %v50_v15 }

// kernel: _lambda_.1
= control target key start
LH: loop header
LB: loop body
LE: loop exit
PB: predicated region body
PF: predicated region fallthrough
CT: control target
= control target key end

     0   :  { %14 = vsyncpa [#allocation3], 0  ;;  %s6249_s0 = inlined_call_operand.vmem [shape: f32[2,16,64], index: 0, kind: input, shape index: {}]   ;;  %s6250_s1 = inlined_call_operand.vmem [shape: f32[3,64,128], index: 1, kind: input, shape index: {}]   ;;  %s6251_s2 = inlined_call_operand.vmem [shape: f32[2,128], index: 2, kind: input, shape index: {}]   ;;  %s6252_s3 = inlined_call_operand.vmem [shape: f32[3,128,128], index: 3, kind: input, shape index: {}]   ;;  %s6253_s4 = inlined_call_operand.vmem [shape: f32[2,128], index: 4, kind: input, shape index: {}]   ;;  %s6254_s5 = inlined_call_operand.hbm [shape: f32[3,128,128], index: 5, kind: input, shape index: {}]   ;;  %s6255_s6 = inlined_call_operand.vmem [shape: f32[2,128], index: 6, kind: input, shape index: {}]   ;;  %s6256_s7 = inlined_call_operand.hbm [shape: f32[3,128,128], index: 7, kind: input, shape index: {}]   ;;  %s6257_s8 = inlined_call_operand.vmem [shape: f32[2,128], index: 8, kind: input, shape index: {}]   ;;  %s6258_s9 = inlined_call_operand.vmem [shape: f32[2,8,128], index: 9, kind: output, shape index: {}]  }
   0x1   :  { %15 = vsyncpa [#allocation5], 0  ;;  %s5283_s30 = smov 0  }
   0x2 LB: > { %s5289_s10 = sadd.s32 4294967295, %s5223_s30   ;;  %p3277_p0 = scmp.ge.s32.totalorder %s5223_s30, 1  ;;  %s5223_s30 = sphi %s5283_s30, %s21_s30  }
   0x3   : > { %p246_p1 = scmp.lt.s32.totalorder %s5223_s30, 3  ;;  %s5225_s11 = smov [#allocation2]  }
   0x4   : > { %s270_s12 = sshll.u32 %s5225_s11, 4  ;;  %p6259_p3 = scmp.eq.s32.totalorder %s5289_s10, 0  ;;  %s271_s12 = int_to_ptr.vmem [resolvable:$true] %s270_s12 }
   0x5   : > { %p5293_p2 = pnand %p3277_p0, %p246_p1  ;;  %s5226_s14 = smov [#allocation4]  }
   0x6   : > { %s286_s15 = sshll.u32 %s5226_s14, 4  ;;  %s5153_s19 = scalar_lea.hbm %s6254_s5, 6144  ;;  %s5306_s15 = int_to_ptr.vmem [resolvable:$true] %s286_s15 }
   0x7   : > { %s6261_s13 = scalar_select %p5293_p2, 1, 0 }
   0x8   : > { %p5118_p4 = pneg %p5293_p2  ;;  %p5154_p6 = scmp.ne.s32.totalorder %s6254_s5, %s5153_s19 }
   0x9   : > { %p5160_p10 = scmp.lt.u32.totalorder %s5153_s19, %s6254_s5 }
   0xa   : > { %p5302_p5 = pnand %p6259_p3, %p5118_p4 }
   0xc   : > { %p5155_p7 = pneg %p5302_p5 }
   0xe   : > { %p5156_p8 = pnand %p5155_p7, %p5154_p6 }
  0x10   : > { %p5157_p9 = pneg %p5156_p8 }
  0x12   : > { %p5162_p11 = pnand %p5160_p10, %p5157_p9 }
  0x14   : > { %5165 = shalt.err (!%p5162_p11)
}
  0x15   : > { %s5166_s24 = scalar_lea.vmem %s271_s12, 6144  ;;  %p5174_p1 = scmp.lt.s32.totalorder %s271_s12, %s271_s12 }
  0x16   : > { %p5167_p12 = scmp.ne.s32.totalorder %s271_s12, %s5166_s24  ;;  %p5175_p4 = scmp.lt.s32.totalorder %s5166_s24, %s5166_s24 }
  0x18   : > { %p5169_p13 = pnand %p5167_p12, %p5155_p7  ;;  %p5176_p3 = por %p5175_p4, %p5174_p1 }
  0x1a   : > { %p5170_p0 = pneg %p5169_p13 }
  0x1c   : > { %p5177_p2 = pnand %p5176_p3, %p5170_p0 }
  0x1e   : > { %5180 = shalt.err (!%p5177_p2)
}
  0x1f   : > { %s5227_s25 = smov 128   ;;  %s5228_s26 = smov 8  }
  0x20   : > { %5121 = dma.hbm_to_vmem [thread:$0]  (!%p5302_p5), %s6254_s5, 6144, %s271_s12, [#allocation3], %s5227_s25, %s5227_s25, %s5228_s26  }
  0x21   : > { %s5181_s14 = scalar_lea.hbm %s6256_s7, 6144 }
  0x22   : > { %p5182_p6 = scmp.ne.s32.totalorder %s6256_s7, %s5181_s14  ;;  %p5188_p8 = scmp.lt.u32.totalorder %s5181_s14, %s6256_s7 }
  0x24   : > { %p5184_p2 = pnand %p5182_p6, %p5155_p7 }
  0x26   : > { %p5185_p3 = pneg %p5184_p2 }
  0x28   : > { %p5190_p9 = pnand %p5188_p8, %p5185_p3 }
  0x2a   : > { %5193 = shalt.err (!%p5190_p9)
}
  0x2b   : > { %s5194_s12 = scalar_lea.vmem %s5306_s15, 6144  ;;  %p5202_p13 = scmp.lt.s32.totalorder %s5306_s15, %s5306_s15 }
  0x2c   : > { %p5195_p10 = scmp.ne.s32.totalorder %s5306_s15, %s5194_s12  ;;  %p5203_p0 = scmp.lt.s32.totalorder %s5194_s12, %s5194_s12 }
  0x2e   : > { %p5197_p11 = pnand %p5195_p10, %p5155_p7  ;;  %p5204_p1 = por %p5203_p0, %p5202_p13 }
  0x30   : > { %p5198_p12 = pneg %p5197_p11 }
  0x32   : > { %p5205_p4 = pnand %p5204_p1, %p5198_p12 }
  0x34   : > { %5208 = shalt.err (!%p5205_p4)
}
  0x35   : > { %5124 = dma.hbm_to_vmem [thread:$0]  (!%p5302_p5), %s6256_s7, 6144, %s5306_s15, [#allocation5], %s5227_s25, %s5227_s25, %s5228_s26  }
  0x36   : > { %p6263_p6 = scmp.ne.s32.totalorder %s6261_s13, 0 }
  0x37   : > { %p6264_p2 = scmp.eq.s32.totalorder (!%p6263_p6), %s5289_s10, 0 }
  0x38   : > { %313 = sbr.rel (%p6263_p6) target bundleno = 3182 (0xc6e), region = 56 }
  0x3f   : > { %5214 = dma.done.wait (%p6264_p2), [#allocation3], 6144   ;;  %p6265_p7 = pmov %p6264_p2 }
  0x40   : > { %p6266_p3 = pmov %p6264_p2 }
  0x41   : > { %5216 = vsyncadd (%p6265_p7), [#allocation3], 4294961152 }
  0x42   : > { %5218 = dma.done.wait (%p6266_p3), [#allocation5], 6144   ;;  %p6267_p8 = pmov %p6264_p2 }
  0x43   : > { %p352_p9 = scmp.lt.s32.totalorder %s5289_s10, 1  ;;  %v361_v0 = vlaneseq  ;;  %vm505_vm0 = vcmask 130048   ;;  %v5229_v8 = vmov 0.0   ;;  %v3291_v10 = vld [vmem:[%s6250_s1 + $0x40] sm:$0xff]  ;;  %v3292_v12 = vld [vmem:[%s6250_s1 + $0x48] sm:$0xff]  ;;  %v3293_v13 = vld [vmem:[%s6250_s1 + $0x50] sm:$0xff] }
  0x44   : > { %5220 = vsyncadd (%p6267_p8), [#allocation5], 4294961152  ;;  %v3294_v14 = vld [vmem:[%s6250_s1 + $0x58] sm:$0xff]  ;;  %v4589_v16 = vpack.c.bf16 %v3292_v12, %v3291_v10  ;;  %v3295_v18 = vld [vmem:[%s6250_s1 + $0x60] sm:$0xff]  ;;  %v5230_v36 = vmov 0.0|0.0  }
  0x45   : > { %s6301_s10 = smov (!%p352_p9, %s5289_s10), 1  ;;  %v5369_v1 = vshrl.u32 %v361_v0, 7  ;;  %v5371_v2 = vand.u32 127, %v361_v0  ;;  %v4593_v17 = vpack.c.bf16 %v3294_v14, %v3293_v13  ;;  %v3296_v19 = vld [vmem:[%s6250_s1 + $0x68] sm:$0xff]  ;;  %v3297_v27 = vld [vmem:[%s6250_s1 + $0x70] sm:$0xff]  ;;  %v3298_v28 = vld [vmem:[%s6250_s1 + $0x78] sm:$0xff] }
  0x46   : > { %s3489_s13 = sshll.u32 %s6301_s10, 4  ;;  %4590 = vmatprep.subr.bf16.mxu0 %v4589_v16  ;;  %v4597_v23 = vpack.c.bf16 %v3296_v19, %v3295_v18  ;;  %v4601_v29 = vpack.c.bf16 %v3298_v28, %v3297_v27  ;;  %v587_v30 = vld [vmem:[%s6250_s1] sm:$0xff]  ;;  %v588_v31 = vld [vmem:[%s6250_s1 + $0x8] sm:$0xff]  ;;  %v5231_v48 = vmov 1.0|1.0   ;;  %v589_v56 = vld [vmem:[%s6250_s1 + $0x10] sm:$0xff] }
  0x47   : > { %v366_v3 = vadd.s32 4294967295, %v5369_v1  ;;  %v5376_v4 = vadd.s32 8, %v5369_v1  ;;  %s356_s23 = scalar_lea.vmem %s6249_s0, %s3489_s13  ;;  %vm372_vm3 = vcmp.eq.s32.totalorder %v5371_v2, %v5369_v1  ;;  %v376_v15 = vadd.s32 1, %v5369_v1  ;;  %4592 = vmatpush3.bf16.msra.mxu0 %v4589_v16  ;;  %v590_v57 = vld [vmem:[%s6250_s1 + $0x18] sm:$0xff]  ;;  %v591_v61 = vld [vmem:[%s6250_s1 + $0x20] sm:$0xff]  ;;  %v592_v62 = vld [vmem:[%s6250_s1 + $0x28] sm:$0xff] }
  0x48   : > { %v503_v6 = vld [vmem:[%s356_s23] sm:$0xff]  ;;  %v504_v7 = vld [vmem:[%s356_s23 + $0x8] sm:$0xff]  ;;  %v5414_v21 = vsel %vm372_vm3, 1.0, %v5229_v8  ;;  %4594 = vmatprep.subr.bf16.mxu0 %v4593_v17  ;;  %v4605_v32 = vpack.c.bf16 %v588_v31, %v587_v30  ;;  %v5453_v33 = vand.u32 7, %v5371_v2  ;;  %v396_v34 = vand.u32 7, %v5369_v1  ;;  %v3307_v13 = vld [vmem:[%s6250_s1 + $0x90] sm:$0xff] }
  0x49   : > { %vm368_vm1 = vcmp.eq.s32.totalorder %v5371_v2, %v366_v3  ;;  %v367_v5 = vadd.s32 4294967295, %v5376_v4  ;;  %v4581_v11 = vpack.c.bf16 %v504_v7, %v503_v6  ;;  %vm373_vm4 = vcmp.eq.s32.totalorder %v5371_v2, %v5376_v4  ;;  %v594_v6 = vld [vmem:[%s6250_s1 + $0x38] sm:$0xff]  ;;  %v3305_v10 = vld [vmem:[%s6250_s1 + $0x80] sm:$0xff]  ;;  %v3311_v19 = vld [vmem:[%s6250_s1 + $0xb0] sm:$0xff]  ;;  %s3286_s17 = sshll.u32 %s6301_s10, 3 }
  0x4a   : > { %v5384_v9 = vsel %vm368_vm1, 1.0, %v5229_v8  ;;  %v377_v22 = vadd.s32 1, %v5376_v4  ;;  %vm378_vm5 = vcmp.eq.s32.totalorder %v5371_v2, %v376_v15  ;;  %v5425_v24 = vsel %vm373_vm4, 1.0, %v5229_v8  ;;  %v3308_v14 = vld [vmem:[%s6250_s1 + $0x98] sm:$0xff]  ;;  %v3309_v16 = vld [vmem:[%s6250_s1 + $0xa0] sm:$0xff]  ;;  %s360_s20 = scalar_lea.vmem %s6258_s9, %s3286_s17 }
  0x4b   : > { %3855 = vmatprep.mubr.msk.f32.mxu1 %vm505_vm0, %v5384_v9  ;;  %vm369_vm2 = vcmp.eq.s32.totalorder %v5371_v2, %v367_v5  ;;  %4582 = vmatprep.subr.bf16.mxu1 %v4581_v11  ;;  %v5428_v25 = vsel %vm378_vm5, 1.0, %v5229_v8  ;;  %v397_v35 = vand.u32 7, %v5376_v4  ;;  %v5459_v37 = vadd.s32 16, %v5369_v1  ;;  %v593_v5 = vld [vmem:[%s6250_s1 + $0x30] sm:$0xff] }
  0x4c   : > { %4584 = vmatpush3.bf16.msra.mxu1 %v4581_v11  ;;  %v5411_v20 = vsel %vm369_vm2, 1.0, %v5229_v8  ;;  %vm379_vm6 = vcmp.eq.s32.totalorder %v5371_v2, %v377_v22  ;;  %4596 = vmatpush3.bf16.msra.mxu0 %v4593_v17  ;;  %v5462_v38 = vadd.s32 24, %v5369_v1  ;;  %v5465_v39 = vadd.s32 32, %v5369_v1  ;;  %v3310_v17 = vld [vmem:[%s6250_s1 + $0xa8] sm:$0xff]  ;;  %v3312_v22 = vld [vmem:[%s6250_s1 + $0xb8] sm:$0xff] }
  0x4d   : > { %4586 = vmatprep.subr.bf16.mxu1 %v4581_v11  ;;  %4598 = vmatprep.subr.bf16.mxu0 %v4597_v23  ;;  %v5436_v26 = vsel %vm379_vm6, 1.0, %v5229_v8  ;;  %v5468_v40 = vadd.s32 40, %v5369_v1  ;;  %vm413_vm7 = vcmp.eq.s32.totalorder %v396_v34, %v5453_v33  ;;  %vm414_vm8 = vcmp.eq.s32.totalorder %v397_v35, %v5453_v33 }
  0x4e   : > { %v5473_v41 = vadd.s32 48, %v5369_v1  ;;  %v5476_v42 = vadd.s32 56, %v5369_v1  ;;  %vm5478_vm9 = vmpackc.low %vm414_vm8, %vm413_vm7  ;;  %v398_v44 = vand.u32 7, %v5459_v37  ;;  %v399_v45 = vand.u32 7, %v5462_v38 }
  0x4f   : > { %3856 = vmatmul.mubr.msk.f32.vlgmr.msra.gmra.mrb[0].mxu1 %vm505_vm0, %v5411_v20  ;;  %v400_v46 = vand.u32 7, %v5465_v39  ;;  %v401_v47 = vand.u32 7, %v5468_v40  ;;  %vm685_vm4 = vcmask 523264   ;;  %v4609_v60 = vpack.c.bf16 %v590_v57, %v589_v56 }
  0x50   : > { %4588 = vmatpush3.bf16.msra.mxu1 %v4581_v11  ;;  %3862 = vmatprep.mubr.msk.f32.mxu1 %vm505_vm0, %v5414_v21  ;;  %vm415_vm10 = vcmp.eq.s32.totalorder %v398_v44, %v5453_v33  ;;  %vm416_vm11 = vcmp.eq.s32.totalorder %v399_v45, %v5453_v33  ;;  %v402_v50 = vand.u32 7, %v5473_v41  ;;  %v403_v51 = vand.u32 7, %v5476_v42 }
  0x51   : > { %4622 = vmatprep.subr.bf16.mxu1 %v4581_v11  ;;  %4600 = vmatpush3.bf16.msra.mxu0 %v4597_v23  ;;  %vm5492_vm12 = vmpackc.low %vm416_vm11, %vm415_vm10  ;;  %vm417_vm13 = vcmp.eq.s32.totalorder %v400_v46, %v5453_v33  ;;  %vm418_vm14 = vcmp.eq.s32.totalorder %v401_v47, %v5453_v33  ;;  %v4613_v0 = vpack.c.bf16 %v592_v62, %v591_v61  ;;  %v5573_v27 = vadd.s32 64, %v5369_v1 }
  0x52   : > { %4602 = vmatprep.subr.bf16.mxu0 %v4601_v29  ;;  %vm5504_vm15 = vmpackc.low %vm418_vm14, %vm417_vm13  ;;  %vm419_vm1 = vcmp.eq.s32.totalorder %v402_v50, %v5453_v33  ;;  %vm420_vm2 = vcmp.eq.s32.totalorder %v403_v51, %v5453_v33  ;;  %v4617_v7 = vpack.c.bf16 %v594_v6, %v593_v5  ;;  %v4629_v15 = vpack.c.bf16 %v3308_v14, %v3307_v13 }
  0x53   : > { %3863 = vmatmul.mubr.msk.f32.vlgmr.msra.gmra.mrb[2].mxu1 %vm505_vm0, %v5425_v24  ;;  %vm5514_vm3 = vmpackc.low %vm420_vm2, %vm419_vm1  ;;  %v4633_v18 = vpack.c.bf16 %v3310_v17, %v3309_v16  ;;  %v4637_v23 = vpack.c.bf16 %v3312_v22, %v3311_v19  ;;  %v5576_v28 = vadd.s32 72, %v5369_v1  ;;  %v5583_v31 = vadd.s32 80, %v5369_v1 }
  0x54   : > { %4624 = vmatpush3.bf16.msra.mxu1 %v4581_v11  ;;  %3907 = vmatprep.mubr.msk.f32.mxu1 %vm505_vm0, %v5428_v25  ;;  %v3306_v11 = vld [vmem:[%s6250_s1 + $0x88] sm:$0xff]  ;;  %v5601_v45 = vadd.s32 96, %v5369_v1  ;;  %v5604_v46 = vadd.s32 104, %v5369_v1 }
  0x55   : > { %4604 = vmatpush3.bf16.msra.mxu0 %v4601_v29  ;;  %4641 = vmatprep.subr.bf16.mxu1 %v5230_v36  ;;  %v4625_v12 = vpack.c.bf16 %v3306_v11, %v3305_v10  ;;  %v404_v29 = vand.u32 7, %v5573_v27  ;;  %v405_v30 = vand.u32 7, %v5576_v28  ;;  %v406_v35 = vand.u32 7, %v5583_v31 }
  0x56   : > { %4606 = vmatprep.subr.bf16.mxu0 %v4605_v32  ;;  %v408_v50 = vand.u32 7, %v5601_v45  ;;  %v409_v51 = vand.u32 7, %v5604_v46 }
  0x57   : > { %3908 = vmatmul.mubr.msk.f32.vlgmr.msra.gmra.mrb[4].mxu1 %vm505_vm0, %v5436_v26  ;;  %vm421_vm5 = vcmp.eq.s32.totalorder %v404_v29, %v5453_v33  ;;  %vm422_vm6 = vcmp.eq.s32.totalorder %v405_v30, %v5453_v33  ;;  %vm423_vm8 = vcmp.eq.s32.totalorder %v406_v35, %v5453_v33 }
  0x58   : > { %4643 = vmatpush3.bf16.msk.msra.mxu1 %vm5478_vm9, %v5231_v48  ;;  %vm5588_vm7 = vmpackc.low %vm422_vm6, %vm421_vm5  ;;  %vm425_vm13 = vcmp.eq.s32.totalorder %v408_v50, %v5453_v33  ;;  %vm426_vm14 = vcmp.eq.s32.totalorder %v409_v51, %v5453_v33  ;;  %vm5232_vm6 = vmmov 0   ;;  %v1181_v51 = vld [vmem:[%s6251_s2] sm:$0x1] }
  0x59   : > { %4644 = vmatprep.subr.bf16.mxu1 %v5230_v36  ;;  %vm5624_vm1 = vmpackc.low %vm426_vm14, %vm425_vm13  ;;  %3961 = vmatprep.mubr.msk.f32.mxu1 %vm5232_vm6, %v5229_v8 }
  0x5c   : > { %4646 = vmatpush3.bf16.msk.msra.mxu1 %vm5492_vm12, %v5231_v48 }
  0x5d   : > { %4647 = vmatprep.subr.bf16.mxu1 %v5230_v36 }
  0x60   : > { %4649 = vmatpush3.bf16.msk.msra.mxu1 %vm5504_vm15, %v5231_v48 }
  0x61   : > { %4650 = vmatprep.subr.bf16.mxu1 %v5230_v36 }
  0x64   : > { %4652 = vmatpush3.bf16.msk.msra.mxu1 %vm5514_vm3, %v5231_v48 }
  0x65   : > { %4653 = vmatprep.subr.bf16.mxu1 %v5230_v36 }
  0x68   : > { %4655 = vmatpush3.bf16.msk.msra.mxu1 %vm5588_vm7, %v5231_v48 }
  0x69   : > { %4656 = vmatprep.subr.bf16.mxu1 %v5230_v36 }
 0x122   : > { %v3857_v54 = vpop.f32.mrb[0].mxu1 }
 0x123   : > { %v578_v55 = vpop.f32.mrb[1].mxu1 }
 0x126   : > { %v3864_v58 = vpop.f32.mrb[2].mxu1 }
 0x127   : > { %v667_v59 = vpop.f32.mrb[3].mxu1 }
 0x128   : > { %3881 = vmatprep.mubr.msk.f32.mxu0 %vm685_vm4, %v667_v59  ;;  %v1866_v59 = vld [vmem:[%s6253_s4] sm:$0x1] }
 0x129   : > { %3882 = vmatmul.mubr.msk.f32.vlgmr.msra.gmra.mrb[0].mxu0 %vm685_vm4, %v3864_v58 }
 0x12a   : > { %4608 = vmatpush3.bf16.msra.mxu0 %v4605_v32  ;;  %3900 = vmatprep.mubr.msk.f32.mxu0 %vm685_vm4, %v578_v55  ;;  %v3909_v63 = vpop.f32.mrb[4].mxu1  ;;  %v5586_v32 = vadd.s32 88, %v5369_v1  ;;  %v5622_v55 = vadd.s32 120, %v5369_v1 }
 0x12b   : > { %4610 = vmatprep.subr.bf16.mxu0 %v4609_v60  ;;  %v920_v3 = vpop.f32.mrb[5].mxu1 }
 0x12c   : > { %v407_v44 = vand.u32 7, %v5586_v32  ;;  %v411_v58 = vand.u32 7, %v5622_v55 }
 0x12e   : > { %4612 = vmatpush3.bf16.msra.mxu0 %v4609_v60  ;;  %vm424_vm10 = vcmp.eq.s32.totalorder %v407_v44, %v5453_v33 }
 0x12f   : > { %4614 = vmatprep.subr.bf16.mxu0 %v4613_v0  ;;  %vm5606_vm11 = vmpackc.low %vm424_vm10, %vm423_vm8 }
 0x130   : > { %4658 = vmatpush3.bf16.msk.msra.mxu1 %vm5606_vm11, %v5231_v48 }
 0x131   : > { %4659 = vmatprep.subr.bf16.mxu1 %v5230_v36 }
 0x132   : > { %4616 = vmatpush3.bf16.msra.mxu0 %v4613_v0 }
 0x133   : > { %4618 = vmatprep.subr.bf16.mxu0 %v4617_v7 }
 0x134   : > { %4661 = vmatpush3.bf16.msk.msra.mxu1 %vm5624_vm1, %v5231_v48 }
 0x135   : > { %4662 = vmatprep.subr.bf16.mxu1 %v5230_v36 }
 0x136   : > { %4620 = vmatpush3.bf16.msra.mxu0 %v4617_v7 }
 0x137   : > { %4626 = vmatprep.subr.bf16.mxu0 %v4625_v12 }
 0x139   : > { %3901 = vmatmul.mubr.msk.f32.vlgmr.msra.gmra.mrb[0].mxu0 %vm685_vm4, %v3857_v54  ;;  %v5619_v54 = vadd.s32 112, %v5369_v1 }
 0x13a   : > { %4628 = vmatpush3.bf16.msra.mxu0 %v4625_v12  ;;  %3926 = vmatprep.mubr.msk.f32.mxu0 %vm685_vm4, %v920_v3 }
 0x13b   : > { %4630 = vmatprep.subr.bf16.mxu0 %v4629_v15  ;;  %v410_v57 = vand.u32 7, %v5619_v54 }
 0x13d   : > { %vm427_vm2 = vcmp.eq.s32.totalorder %v410_v57, %v5453_v33  ;;  %v5685_v57 = vsub.s32 0, %v5369_v1 }
 0x13e   : > { %4632 = vmatpush3.bf16.msra.mxu0 %v4629_v15 }
 0x13f   : > { %4634 = vmatprep.subr.bf16.mxu0 %v4633_v18 }
 0x142   : > { %4636 = vmatpush3.bf16.msra.mxu0 %v4633_v18 }
 0x143   : > { %4638 = vmatprep.subr.bf16.mxu0 %v4637_v23 }
 0x146   : > { %4640 = vmatpush3.bf16.msra.mxu0 %v4637_v23 }
 0x149   : > { %3927 = vmatmul.mubr.msk.f32.vlgmr.msra.gmra.mrb[0].mxu0 %vm685_vm4, %v3909_v63  ;;  %vm428_vm4 = vcmp.eq.s32.totalorder %v411_v58, %v5453_v33 }
 0x14a   : > { %4010 = vmatprep.mubr.msk.f32.mxu0 %vm505_vm0, %v5414_v21  ;;  %vm5636_vm5 = vmpackc.low %vm428_vm4, %vm427_vm2 }
 0x14b   : > { %4664 = vmatpush3.bf16.msk.msra.mxu1 %vm5636_vm5, %v5231_v48 }
 0x14c   : > { %4665 = vmatprep.subr.bf16.mxu1 %v5230_v36 }
 0x21c   : > { %v3928_v60 = vpop.f32.mrb[0].mxu0 }
 0x21d   : > { %v1029_v61 = vmul.f32 %v3928_v60, %v3928_v60  ;;  %v1010_v62 = vpop.f32.mrb[1].mxu0 }
 0x21e   : > { %v1021_v63 = vadd.f32 %v3928_v60, %v1010_v62  ;;  %v1028_v0 = vmul.f32 %v1010_v62, %v1010_v62 }
 0x220   : > { %v1022_v33 = vrot.slane %v1021_v63, 4  ;;  %v1030_v3 = vadd.f32 %v1029_v61, %v1028_v0 }
 0x222   : > { %v1023_v5 = vadd.f32 %v1022_v33, %v1021_v63  ;;  %v1031_v12 = vrot.slane %v1030_v3, 4  ;;  %v1185_v63 = vld [vmem:[%s6251_s2 + $0x1] sm:$0x1] }
 0x224   : > { %v1024_v6 = vrot.slane %v1023_v5, 2  ;;  %v1032_v13 = vadd.f32 %v1031_v12, %v1030_v3 }
 0x226   : > { %v1025_v7 = vadd.f32 %v1024_v6, %v1023_v5  ;;  %v1033_v14 = vrot.slane %v1032_v13, 2 }
 0x228   : > { %v1026_v10 = vrot.slane %v1025_v7, 1  ;;  %v1034_v15 = vadd.f32 %v1033_v14, %v1032_v13  ;;  %v3351_v14 = vld [vmem:[%s6252_s3 + $0x80] sm:$0xff] }
 0x22a   : > { %v1027_v11 = vadd.f32 %v1026_v10, %v1025_v7  ;;  %v1035_v16 = vrot.slane %v1034_v15, 1 }
 0x22c   : > { %3962 = vmatmul.mubr.f32.vlgmr.msra.gmra.mrb[6].mxu1 %v1027_v11  ;;  %v1036_v17 = vadd.f32 %v1035_v16, %v1034_v15  ;;  %v3352_v15 = vld [vmem:[%s6252_s3 + $0x88] sm:$0xff] }
 0x22d   : > { %4667 = vmatpush3.bf16.msk.msra.mxu1 %vm5478_vm9, %v5231_v48  ;;  %3996 = vmatprep.mubr.msk.f32.mxu1 %vm5232_vm6, %v5229_v8 }
 0x22e   : > { %4668 = vmatprep.subr.bf16.mxu1 %v5230_v36 }
 0x231   : > { %4670 = vmatpush3.bf16.msk.msra.mxu1 %vm5492_vm12, %v5231_v48 }
 0x232   : > { %4671 = vmatprep.subr.bf16.mxu1 %v5230_v36 }
 0x235   : > { %4673 = vmatpush3.bf16.msk.msra.mxu1 %vm5504_vm15, %v5231_v48 }
 0x236   : > { %4674 = vmatprep.subr.bf16.mxu1 %v5230_v36 }
 0x239   : > { %4676 = vmatpush3.bf16.msk.msra.mxu1 %vm5514_vm3, %v5231_v48 }
 0x23a   : > { %4677 = vmatprep.subr.bf16.mxu1 %v5230_v36 }
 0x23d   : > { %4679 = vmatpush3.bf16.msk.msra.mxu1 %vm5588_vm7, %v5231_v48 }
 0x23e   : > { %4680 = vmatprep.subr.bf16.mxu1 %v5230_v36 }
 0x241   : > { %4682 = vmatpush3.bf16.msk.msra.mxu1 %vm5606_vm11, %v5231_v48 }
 0x242   : > { %4683 = vmatprep.subr.bf16.mxu1 %v5230_v36 }
 0x245   : > { %4685 = vmatpush3.bf16.msk.msra.mxu1 %vm5624_vm1, %v5231_v48 }
 0x246   : > { %4686 = vmatprep.subr.bf16.mxu1 %v5230_v36 }
 0x249   : > { %4688 = vmatpush3.bf16.msk.msra.mxu1 %vm5636_vm5, %v5231_v48 }
 0x24c   : > { %3997 = vmatmul.mubr.f32.vlgmr.msra.gmra.mrb[8].mxu1 %v1036_v17 }
 0x24d   : > { %4003 = vmatprep.mubr.msk.f32.mxu1 %vm505_vm0, %v5384_v9 }
 0x2ff   : > { %v1103_v18 = vpop.f32.mrb[6].mxu1 }
 0x300   : > { %v3963_v19 = vpop.f32.mrb[7].mxu1  ;;  %v1107_v22 = vmul.f32 0.00390625, %v1103_v18 }
 0x301   : > { %v4697_v19 = vpack.c.bf16 %v3352_v15, %v3351_v14 }
 0x302   : > { %v1179_v29 = vmul.f32 %v1107_v22, %v1107_v22 }
 0x31f   : > { %v1174_v23 = vpop.f32.mrb[8].mxu1 }
 0x320   : > { %v1178_v30 = vmul.f32 0.00390625, %v1174_v23  ;;  %v3998_v35 = vpop.f32.mrb[9].mxu1  ;;  %v3355_v23 = vld [vmem:[%s6252_s3 + $0xa0] sm:$0xff] }
 0x321   : > { %v3359_v35 = vld [vmem:[%s6252_s3 + $0xc0] sm:$0xff] }
 0x322   : > { %v1180_v44 = vsub.f32 %v1178_v30, %v1179_v29  ;;  %v3356_v29 = vld [vmem:[%s6252_s3 + $0xa8] sm:$0xff]  ;;  %v3358_v30 = vld [vmem:[%s6252_s3 + $0xb8] sm:$0xff] }
 0x324   : > { %v1182_v50 = vadd.f32 1e-05, %v1180_v44  ;;  %v3360_v44 = vld [vmem:[%s6252_s3 + $0xc8] sm:$0xff] }
 0x326   : > { %5145 = vrsqrt.f32 %v1182_v50  ;;  %v4713_v50 = vpack.c.bf16 %v3360_v44, %v3359_v35  ;;  %v1289_v44 = vld [vmem:[%s6252_s3 + $0x50] sm:$0xff] }
 0x330   : > { %v5146_v58 = vpop.eup %5145 }
 0x331   : > { %v1184_v61 = vmul.f32 %v5146_v58, %v1181_v51  ;;  %v3361_v51 = vld [vmem:[%s6252_s3 + $0xd0] sm:$0xff]  ;;  %v3362_v58 = vld [vmem:[%s6252_s3 + $0xd8] sm:$0xff] }
 0x333   : > { %v1186_v0 = vmul.f32 %v1184_v61, %v1107_v22  ;;  %v1191_v33 = vrot.slane %v1184_v61, %v5685_v57  ;;  %v4717_v61 = vpack.c.bf16 %v3362_v58, %v3361_v51  ;;  %v1291_v58 = vld [vmem:[%s6252_s3 + $0x60] sm:$0xff] }
 0x335   : > { %v1187_v3 = vsub.f32 %v1185_v63, %v1186_v0  ;;  %v1192_v5 = vmul.f32 %v1191_v33, %v1010_v62  ;;  %v1193_v6 = vmul.f32 %v3928_v60, %v1191_v33  ;;  %v3353_v60 = vld [vmem:[%s6252_s3 + $0x90] sm:$0xff]  ;;  %v3354_v62 = vld [vmem:[%s6252_s3 + $0x98] sm:$0xff]  ;;  %v3363_v63 = vld [vmem:[%s6252_s3 + $0xe0] sm:$0xff] }
 0x336   : > { %v4701_v22 = vpack.c.bf16 %v3354_v62, %v3353_v60  ;;  %v3364_v0 = vld [vmem:[%s6252_s3 + $0xe8] sm:$0xff] }
 0x337   : > { %v1197_v7 = vrot.slane %v1187_v3, %v5685_v57  ;;  %v4721_v33 = vpack.c.bf16 %v3364_v0, %v3363_v63  ;;  %v3365_v3 = vld [vmem:[%s6252_s3 + $0xf0] sm:$0xff]  ;;  %v1284_v60 = vld [vmem:[%s6252_s3 + $0x28] sm:$0xff] }
 0x338   : > { %v1293_v0 = vld [vmem:[%s6252_s3 + $0x70] sm:$0xff] }
 0x339   : > { %v1198_v10 = vadd.f32 %v1197_v7, %v1192_v5  ;;  %v1199_v11 = vadd.f32 %v1197_v7, %v1193_v6  ;;  %v3366_v5 = vld [vmem:[%s6252_s3 + $0xf8] sm:$0xff]  ;;  %v1279_v7 = vld [vmem:[%s6252_s3] sm:$0xff] }
 0x33a   : > { %v4725_v6 = vpack.c.bf16 %v3366_v5, %v3365_v3  ;;  %v3369_v5 = vld [vmem:[%s6252_s3 + $0x100] sm:$0xff] }
 0x33b   : > { %v1200_v12 = vmul.f32 0.01, %v1198_v10  ;;  %v1201_v13 = vmul.f32 0.01, %v1199_v11 }
 0x33d   : > { %v1202_v16 = vmax.f32 %v1198_v10, %v1200_v12  ;;  %v1203_v17 = vmax.f32 %v1199_v11, %v1201_v13  ;;  %v1280_v10 = vld [vmem:[%s6252_s3 + $0x8] sm:$0xff]  ;;  %v1281_v12 = vld [vmem:[%s6252_s3 + $0x10] sm:$0xff]  ;;  %v1282_v13 = vld [vmem:[%s6252_s3 + $0x18] sm:$0xff] }
 0x33e   : > { %v4729_v11 = vpack.c.bf16 %v1280_v10, %v1279_v7  ;;  %v3371_v10 = vld [vmem:[%s6252_s3 + $0x110] sm:$0xff] }
 0x33f   : > { %v4689_v18 = vpack.c.bf16 %v1203_v17, %v1202_v16  ;;  %v4733_v17 = vpack.c.bf16 %v1282_v13, %v1281_v12  ;;  %v3373_v13 = vld [vmem:[%s6252_s3 + $0x120] sm:$0xff] }
 0x341   : > { %4690 = vmatprep.subr.bf16.mxu1 %v4689_v18  ;;  %4694 = vmatprep.subr.bf16.mxu0 %v4689_v18 }
 0x342   : > { %4692 = vmatpush3.bf16.msra.mxu1 %v4689_v18  ;;  %4696 = vmatpush3.bf16.msra.mxu0 %v4689_v18 }
 0x343   : > { %4762 = vmatprep.subr.bf16.mxu1 %v4689_v18  ;;  %4698 = vmatprep.subr.bf16.mxu0 %v4697_v19 }
 0x345   : > { %4011 = vmatmul.mubr.msk.f32.vlgmr.msra.gmra.mrb[2].mxu0 %vm505_vm0, %v5425_v24  ;;  %4004 = vmatmul.mubr.msk.f32.vlgmr.msra.gmra.mrb[10].mxu1 %vm505_vm0, %v5411_v20  ;;  %v4705_v24 = vpack.c.bf16 %v3356_v29, %v3355_v23  ;;  %v3357_v20 = vld [vmem:[%s6252_s3 + $0xb0] sm:$0xff] }
 0x346   : > { %4764 = vmatpush3.bf16.msra.mxu1 %v4689_v18  ;;  %4087 = vmatprep.mubr.msk.f32.mxu1 %vm505_vm0, %v5428_v25  ;;  %v1285_v29 = vld [vmem:[%s6252_s3 + $0x30] sm:$0xff] }
 0x347   : > { %4700 = vmatpush3.bf16.msra.mxu0 %v4697_v19  ;;  %4797 = vmatprep.subr.bf16.mxu1 %v5230_v36  ;;  %v1283_v19 = vld [vmem:[%s6252_s3 + $0x20] sm:$0xff] }
 0x348   : > { %4702 = vmatprep.subr.bf16.mxu0 %v4701_v22 }
 0x349   : > { %4088 = vmatmul.mubr.msk.f32.vlgmr.msra.gmra.mrb[12].mxu1 %vm505_vm0, %v5436_v26  ;;  %v4709_v26 = vpack.c.bf16 %v3358_v30, %v3357_v20  ;;  %v1287_v30 = vld [vmem:[%s6252_s3 + $0x40] sm:$0xff] }
 0x34a   : > { %4799 = vmatpush3.bf16.msk.msra.mxu1 %vm5478_vm9, %v5231_v48  ;;  %4157 = vmatprep.mubr.msk.f32.mxu1 %vm5232_vm6, %v5229_v8 }
 0x34b   : > { %4704 = vmatpush3.bf16.msra.mxu0 %v4701_v22  ;;  %4800 = vmatprep.subr.bf16.mxu1 %v5230_v36  ;;  %v4737_v22 = vpack.c.bf16 %v1284_v60, %v1283_v19  ;;  %v3377_v60 = vld [vmem:[%s6252_s3 + $0x140] sm:$0xff] }
 0x34c   : > { %4706 = vmatprep.subr.bf16.mxu0 %v4705_v24 }
 0x34e   : > { %4802 = vmatpush3.bf16.msk.msra.mxu1 %vm5492_vm12, %v5231_v48 }
 0x34f   : > { %4708 = vmatpush3.bf16.msra.mxu0 %v4705_v24  ;;  %4803 = vmatprep.subr.bf16.mxu1 %v5230_v36  ;;  %v1286_v24 = vld [vmem:[%s6252_s3 + $0x38] sm:$0xff] }
 0x350   : > { %4710 = vmatprep.subr.bf16.mxu0 %v4709_v26  ;;  %v4741_v20 = vpack.c.bf16 %v1286_v24, %v1285_v29  ;;  %v3380_v29 = vld [vmem:[%s6252_s3 + $0x158] sm:$0xff] }
 0x352   : > { %4805 = vmatpush3.bf16.msk.msra.mxu1 %vm5504_vm15, %v5231_v48 }
 0x353   : > { %4712 = vmatpush3.bf16.msra.mxu0 %v4709_v26  ;;  %4806 = vmatprep.subr.bf16.mxu1 %v5230_v36  ;;  %v1288_v26 = vld [vmem:[%s6252_s3 + $0x48] sm:$0xff] }
 0x354   : > { %4714 = vmatprep.subr.bf16.mxu0 %v4713_v50  ;;  %v4745_v35 = vpack.c.bf16 %v1288_v26, %v1287_v30  ;;  %v3382_v30 = vld [vmem:[%s6252_s3 + $0x168] sm:$0xff] }
 0x356   : > { %4808 = vmatpush3.bf16.msk.msra.mxu1 %vm5514_vm3, %v5231_v48 }
 0x357   : > { %4716 = vmatpush3.bf16.msra.mxu0 %v4713_v50  ;;  %4809 = vmatprep.subr.bf16.mxu1 %v5230_v36  ;;  %v1290_v50 = vld [vmem:[%s6252_s3 + $0x58] sm:$0xff] }
 0x358   : > { %4718 = vmatprep.subr.bf16.mxu0 %v4717_v61  ;;  %v4749_v51 = vpack.c.bf16 %v1290_v50, %v1289_v44  ;;  %v3384_v44 = vld [vmem:[%s6252_s3 + $0x178] sm:$0xff] }
 0x35a   : > { %4811 = vmatpush3.bf16.msk.msra.mxu1 %vm5588_vm7, %v5231_v48 }
 0x35b   : > { %4720 = vmatpush3.bf16.msra.mxu0 %v4717_v61  ;;  %4812 = vmatprep.subr.bf16.mxu1 %v5230_v36  ;;  %v1292_v61 = vld [vmem:[%s6252_s3 + $0x68] sm:$0xff] }
 0x35c   : > { %4722 = vmatprep.subr.bf16.mxu0 %v4721_v33  ;;  %v4753_v63 = vpack.c.bf16 %v1292_v61, %v1291_v58 }
 0x35e   : > { %4814 = vmatpush3.bf16.msk.msra.mxu1 %vm5606_vm11, %v5231_v48 }
 0x35f   : > { %4724 = vmatpush3.bf16.msra.mxu0 %v4721_v33  ;;  %4815 = vmatprep.subr.bf16.mxu1 %v5230_v36  ;;  %v1294_v33 = vld [vmem:[%s6252_s3 + $0x78] sm:$0xff] }
 0x360   : > { %4726 = vmatprep.subr.bf16.mxu0 %v4725_v6  ;;  %v4757_v3 = vpack.c.bf16 %v1294_v33, %v1293_v0 }
 0x362   : > { %4817 = vmatpush3.bf16.msk.msra.mxu1 %vm5624_vm1, %v5231_v48 }
 0x363   : > { %4728 = vmatpush3.bf16.msra.mxu0 %v4725_v6  ;;  %4818 = vmatprep.subr.bf16.mxu1 %v5230_v36  ;;  %v3370_v6 = vld [vmem:[%s6252_s3 + $0x108] sm:$0xff] }
 0x364   : > { %4730 = vmatprep.subr.bf16.mxu0 %v4729_v11  ;;  %v4765_v7 = vpack.c.bf16 %v3370_v6, %v3369_v5 }
 0x366   : > { %4820 = vmatpush3.bf16.msk.msra.mxu1 %vm5636_vm5, %v5231_v48 }
 0x367   : > { %4821 = vmatprep.subr.bf16.mxu1 %v5230_v36 }
 0x418   : > { %v4012_v14 = vpop.f32.mrb[2].mxu0  ;;  %v4005_v15 = vpop.f32.mrb[10].mxu1 }
 0x419   : > { %v1361_v16 = vpop.f32.mrb[3].mxu0  ;;  %v1270_v18 = vpop.f32.mrb[11].mxu1 }
 0x41a   : > { %4045 = vmatprep.mubr.f32.mxu0 %v1361_v16 }
 0x41b   : > { %4046 = vmatmul.mubr.f32.vlgmr.msra.gmra.mrb[4].mxu0 %v4012_v14  ;;  %v3374_v14 = vld [vmem:[%s6252_s3 + $0x128] sm:$0xff] }
 0x41c   : > { %4732 = vmatpush3.bf16.msra.mxu0 %v4729_v11  ;;  %4080 = vmatprep.mubr.f32.mxu0 %v1270_v18  ;;  %v5801_v62 = vpop.f32.mrb[12].mxu1  ;;  %v3372_v11 = vld [vmem:[%s6252_s3 + $0x118] sm:$0xff]  ;;  %v4773_v16 = vpack.c.bf16 %v3374_v14, %v3373_v13 }
 0x41d   : > { %4734 = vmatprep.subr.bf16.mxu0 %v4733_v17  ;;  %v1603_v23 = vpop.f32.mrb[13].mxu1  ;;  %v4769_v12 = vpack.c.bf16 %v3372_v11, %v3371_v10  ;;  %v3376_v18 = vld [vmem:[%s6252_s3 + $0x138] sm:$0xff] }
 0x420   : > { %4736 = vmatpush3.bf16.msra.mxu0 %v4733_v17  ;;  %v3375_v17 = vld [vmem:[%s6252_s3 + $0x130] sm:$0xff] }
 0x421   : > { %4738 = vmatprep.subr.bf16.mxu0 %v4737_v22  ;;  %v4777_v19 = vpack.c.bf16 %v3376_v18, %v3375_v17 }
 0x424   : > { %4740 = vmatpush3.bf16.msra.mxu0 %v4737_v22 }
 0x425   : > { %4742 = vmatprep.subr.bf16.mxu0 %v4741_v20 }
 0x428   : > { %4744 = vmatpush3.bf16.msra.mxu0 %v4741_v20  ;;  %v3381_v20 = vld [vmem:[%s6252_s3 + $0x160] sm:$0xff] }
 0x429   : > { %4746 = vmatprep.subr.bf16.mxu0 %v4745_v35  ;;  %v4789_v26 = vpack.c.bf16 %v3382_v30, %v3381_v20 }
 0x42c   : > { %4748 = vmatpush3.bf16.msra.mxu0 %v4745_v35  ;;  %v3383_v35 = vld [vmem:[%s6252_s3 + $0x170] sm:$0xff] }
 0x42d   : > { %4750 = vmatprep.subr.bf16.mxu0 %v4749_v51  ;;  %v4793_v50 = vpack.c.bf16 %v3384_v44, %v3383_v35 }
 0x430   : > { %4752 = vmatpush3.bf16.msra.mxu0 %v4749_v51 }
 0x431   : > { %4754 = vmatprep.subr.bf16.mxu0 %v4753_v63 }
 0x434   : > { %4756 = vmatpush3.bf16.msra.mxu0 %v4753_v63 }
 0x435   : > { %4758 = vmatprep.subr.bf16.mxu0 %v4757_v3 }
 0x438   : > { %4760 = vmatpush3.bf16.msra.mxu0 %v4757_v3 }
 0x439   : > { %4766 = vmatprep.subr.bf16.mxu0 %v4765_v7 }
 0x43b   : > { %4081 = vmatmul.mubr.f32.vlgmr.msra.gmra.mrb[4].mxu0 %v4005_v15  ;;  %v3378_v15 = vld [vmem:[%s6252_s3 + $0x148] sm:$0xff] }
 0x43c   : > { %4768 = vmatpush3.bf16.msra.mxu0 %v4765_v7  ;;  %4122 = vmatprep.mubr.f32.mxu0 %v1603_v23  ;;  %v4781_v22 = vpack.c.bf16 %v3378_v15, %v3377_v60  ;;  %v3379_v23 = vld [vmem:[%s6252_s3 + $0x150] sm:$0xff] }
 0x43d   : > { %4770 = vmatprep.subr.bf16.mxu0 %v4769_v12  ;;  %v4785_v24 = vpack.c.bf16 %v3380_v29, %v3379_v23 }
 0x440   : > { %4772 = vmatpush3.bf16.msra.mxu0 %v4769_v12 }
 0x441   : > { %4774 = vmatprep.subr.bf16.mxu0 %v4773_v16 }
 0x444   : > { %4776 = vmatpush3.bf16.msra.mxu0 %v4773_v16 }
 0x445   : > { %4778 = vmatprep.subr.bf16.mxu0 %v4777_v19 }
 0x448   : > { %4780 = vmatpush3.bf16.msra.mxu0 %v4777_v19 }
 0x449   : > { %4782 = vmatprep.subr.bf16.mxu0 %v4781_v22 }
 0x44c   : > { %4784 = vmatpush3.bf16.msra.mxu0 %v4781_v22  ;;  %v1870_v22 = vld [vmem:[%s6253_s4 + $0x1] sm:$0x1] }
 0x44d   : > { %4786 = vmatprep.subr.bf16.mxu0 %v4785_v24 }
 0x450   : > { %4788 = vmatpush3.bf16.msra.mxu0 %v4785_v24 }
 0x451   : > { %4790 = vmatprep.subr.bf16.mxu0 %v4789_v26 }
 0x454   : > { %4792 = vmatpush3.bf16.msra.mxu0 %v4789_v26  ;;  %v445_v26 = vmul.u32 2, %v5369_v1 }
 0x455   : > { %4794 = vmatprep.subr.bf16.mxu0 %v4793_v50 }
 0x458   : > { %4796 = vmatpush3.bf16.msra.mxu0 %v4793_v50 }
 0x459   : > { %4899 = vmatprep.subr.bf16.mxu0 %v5230_v36 }
 0x45b   : > { %4123 = vmatmul.mubr.f32.vlgmr.msra.gmra.mrb[4].mxu0 %v5801_v62 }
 0x45c   : > { %4283 = vmatprep.mubr.msk.f32.mxu0 %vm5232_vm6, %v5229_v8 }
 0x52e   : > { %v4124_v51 = vpop.f32.mrb[4].mxu0 }
 0x52f   : > { %v1714_v58 = vmul.f32 %v4124_v51, %v4124_v51  ;;  %v1695_v61 = vpop.f32.mrb[5].mxu0 }
 0x530   : > { %v1706_v63 = vadd.f32 %v4124_v51, %v1695_v61  ;;  %v1713_v0 = vmul.f32 %v1695_v61, %v1695_v61 }
 0x532   : > { %v1707_v33 = vrot.slane %v1706_v63, 4  ;;  %v1715_v3 = vadd.f32 %v1714_v58, %v1713_v0  ;;  %v446_v58 = vadd.s32 4294967295, %v445_v26 }
 0x534   : > { %v1708_v5 = vadd.f32 %v1707_v33, %v1706_v63  ;;  %v1716_v62 = vrot.slane %v1715_v3, 4  ;;  %v451_v63 = vadd.s32 1, %v445_v26 }
 0x536   : > { %v1709_v6 = vrot.slane %v1708_v5, 2  ;;  %v1717_v43 = vadd.f32 %v1716_v62, %v1715_v3 }
 0x538   : > { %v1710_v7 = vadd.f32 %v1709_v6, %v1708_v5  ;;  %v1718_v49 = vrot.slane %v1717_v43, 2 }
 0x53a   : > { %v1711_v10 = vrot.slane %v1710_v7, 1  ;;  %v1719_v52 = vadd.f32 %v1718_v49, %v1717_v43  ;;  %v2054_v43 = vld [vmem:[#allocation2 + $0x90] sm:$0xff]  ;;  %v2055_v49 = vld [vmem:[#allocation2 + $0x98] sm:$0xff] }
 0x53c   : > { %v1712_v11 = vadd.f32 %v1711_v10, %v1710_v7  ;;  %v1720_v53 = vrot.slane %v1719_v52, 1  ;;  %v2052_v7 = vld [vmem:[#allocation2 + $0x80] sm:$0xff]  ;;  %v2053_v10 = vld [vmem:[#allocation2 + $0x88] sm:$0xff] }
 0x53d   : > { %v4852_v62 = vpack.c.bf16 %v2053_v10, %v2052_v7 }
 0x53e   : > { %4158 = vmatmul.mubr.f32.vlgmr.msra.gmra.mrb[14].mxu1 %v1712_v11  ;;  %v1721_v34 = vadd.f32 %v1720_v53, %v1719_v52  ;;  %v4855_v52 = vpack.c.bf16 %v2055_v49, %v2054_v43  ;;  %v2056_v53 = vld [vmem:[#allocation2 + $0xa0] sm:$0xff]  ;;  %v1968_v49 = vld [vmem:[#allocation2 + $0x30] sm:$0xff] }
 0x53f   : > { %4823 = vmatpush3.bf16.msk.msra.mxu1 %vm5478_vm9, %v5231_v48  ;;  %4192 = vmatprep.mubr.msk.f32.mxu1 %vm5232_vm6, %v5229_v8  ;;  %vm447_vm9 = vcmp.eq.s32.totalorder %v5371_v2, %v446_v58  ;;  %v459_v58 = vand.u32 15, %v5468_v40  ;;  %v463_v40 = vand.u32 15, %v5576_v28  ;;  %v1963_v28 = vld [vmem:[#allocation2 + $0x8] sm:$0xff] }
 0x540   : > { %4824 = vmatprep.subr.bf16.mxu1 %v5230_v36 }
 0x543   : > { %4826 = vmatpush3.bf16.msk.msra.mxu1 %vm5492_vm12, %v5231_v48  ;;  %vm452_vm12 = vcmp.eq.s32.totalorder %v5371_v2, %v451_v63 }
 0x544   : > { %4827 = vmatprep.subr.bf16.mxu1 %v5230_v36 }
 0x547   : > { %4829 = vmatpush3.bf16.msk.msra.mxu1 %vm5504_vm15, %v5231_v48  ;;  %vm449_vm15 = vcmp.eq.s32.totalorder %v5371_v2, %v445_v26  ;;  %v455_v26 = vand.u32 15, %v5376_v4  ;;  %v460_v4 = vand.u32 15, %v5473_v41 }
 0x548   : > { %4830 = vmatprep.subr.bf16.mxu1 %v5230_v36  ;;  %v450_v11 = vsel %vm449_vm15, 1.0, %v5229_v8 }
 0x54b   : > { %4832 = vmatpush3.bf16.msk.msra.mxu1 %vm5514_vm3, %v5231_v48 }
 0x54c   : > { %4833 = vmatprep.subr.bf16.mxu1 %v5230_v36 }
 0x54f   : > { %4835 = vmatpush3.bf16.msk.msra.mxu1 %vm5588_vm7, %v5231_v48 }
 0x550   : > { %4836 = vmatprep.subr.bf16.mxu1 %v5230_v36 }
 0x553   : > { %4838 = vmatpush3.bf16.msk.msra.mxu1 %vm5606_vm11, %v5231_v48 }
 0x554   : > { %4839 = vmatprep.subr.bf16.mxu1 %v5230_v36 }
 0x557   : > { %4841 = vmatpush3.bf16.msk.msra.mxu1 %vm5624_vm1, %v5231_v48 }
 0x558   : > { %4842 = vmatprep.subr.bf16.mxu1 %v5230_v36 }
 0x55b   : > { %4844 = vmatpush3.bf16.msk.msra.mxu1 %vm5636_vm5, %v5231_v48 }
 0x55c   : > { %4845 = vmatprep.subr.bf16.mxu1 %v5230_v36 }
 0x55e   : > { %4193 = vmatmul.mubr.f32.vlgmr.msra.gmra.mrb[16].mxu1 %v1721_v34  ;;  %v2057_v34 = vld [vmem:[#allocation2 + $0xa8] sm:$0xff] }
 0x55f   : > { %4199 = vmatprep.mubr.msk.f32.mxu1 %vm5232_vm6, %v5229_v8 }
 0x611   : > { %v1788_v47 = vpop.f32.mrb[14].mxu1 }
 0x612   : > { %v4159_v12 = vpop.f32.mrb[15].mxu1  ;;  %v1792_v13 = vmul.f32 0.00390625, %v1788_v47  ;;  %v4858_v47 = vpack.c.bf16 %v2057_v34, %v2056_v53  ;;  %v1970_v34 = vld [vmem:[#allocation2 + $0x40] sm:$0xff] }
 0x613   : > { %v2058_v12 = vld [vmem:[#allocation2 + $0xb0] sm:$0xff] }
 0x614   : > { %v1864_v56 = vmul.f32 %v1792_v13, %v1792_v13 }
 0x631   : > { %v1859_v14 = vpop.f32.mrb[16].mxu1 }
 0x632   : > { %v1863_v16 = vmul.f32 0.00390625, %v1859_v14  ;;  %v4194_v17 = vpop.f32.mrb[17].mxu1 }
 0x634   : > { %v1865_v18 = vsub.f32 %v1863_v16, %v1864_v56  ;;  %v2060_v56 = vld [vmem:[#allocation2 + $0xc0] sm:$0xff]  ;;  %v2061_v16 = vld [vmem:[#allocation2 + $0xc8] sm:$0xff] }
 0x635   : > { %v4864_v17 = vpack.c.bf16 %v2061_v16, %v2060_v56  ;;  %v1974_v16 = vld [vmem:[#allocation2 + $0x60] sm:$0xff] }
 0x636   : > { %v1867_v19 = vadd.f32 1e-05, %v1865_v18  ;;  %v2062_v18 = vld [vmem:[#allocation2 + $0xd0] sm:$0xff] }
 0x638   : > { %5147 = vrsqrt.f32 %v1867_v19  ;;  %v2063_v19 = vld [vmem:[#allocation2 + $0xd8] sm:$0xff] }
 0x642   : > { %v5148_v60 = vpop.eup %5147 }
 0x643   : > { %v1869_v15 = vmul.f32 %v5148_v60, %v1866_v59  ;;  %v4867_v59 = vpack.c.bf16 %v2063_v19, %v2062_v18  ;;  %v2064_v60 = vld [vmem:[#allocation2 + $0xe0] sm:$0xff]  ;;  %v1976_v19 = vld [vmem:[#allocation2 + $0x70] sm:$0xff] }
 0x645   : > { %v1871_v23 = vmul.f32 %v1869_v15, %v1792_v13  ;;  %v1876_v29 = vrot.slane %v1869_v15, %v5685_v57  ;;  %v2059_v13 = vld [vmem:[#allocation2 + $0xb8] sm:$0xff]  ;;  %v2065_v15 = vld [vmem:[#allocation2 + $0xe8] sm:$0xff] }
 0x646   : > { %v4861_v14 = vpack.c.bf16 %v2059_v13, %v2058_v12  ;;  %v1972_v13 = vld [vmem:[#allocation2 + $0x50] sm:$0xff] }
 0x647   : > { %v1872_v24 = vsub.f32 %v1870_v22, %v1871_v23  ;;  %v1877_v20 = vmul.f32 %v1876_v29, %v1695_v61  ;;  %v1878_v30 = vmul.f32 %v4124_v51, %v1876_v29  ;;  %v448_v51 = vsel %vm447_vm9, 1.0, %v5229_v8  ;;  %v2066_v23 = vld [vmem:[#allocation2 + $0xf0] sm:$0xff]  ;;  %v2067_v29 = vld [vmem:[#allocation2 + $0xf8] sm:$0xff] }
 0x648   : > { %v453_v61 = vsel %vm452_vm12, 1.0, %v5229_v8  ;;  %v4870_v22 = vpack.c.bf16 %v2065_v15, %v2064_v60  ;;  %v2282_v15 = vld [vmem:[#allocation2 + $0x100] sm:$0xff] }
 0x649   : > { %v1882_v35 = vrot.slane %v1872_v24, %v5685_v57  ;;  %v4873_v24 = vpack.c.bf16 %v2067_v29, %v2066_v23  ;;  %v2284_v29 = vld [vmem:[#allocation2 + $0x110] sm:$0xff] }
 0x64b   : > { %v1883_v44 = vadd.f32 %v1882_v35, %v1877_v20  ;;  %v1884_v50 = vadd.f32 %v1882_v35, %v1878_v30  ;;  %v5957_v20 = vand.u32 15, %v5371_v2  ;;  %v454_v30 = vand.u32 15, %v5369_v1 }
 0x64c   : > { %v456_v35 = vand.u32 15, %v5459_v37  ;;  %v461_v37 = vand.u32 15, %v5476_v42 }
 0x64d   : > { %v1885_v0 = vmul.f32 0.01, %v1883_v44  ;;  %v1886_v33 = vmul.f32 0.01, %v1884_v50  ;;  %vm472_vm3 = vcmp.eq.s32.totalorder %v455_v26, %v5957_v20  ;;  %vm476_vm14 = vcmp.eq.s32.totalorder %v459_v58, %v5957_v20  ;;  %v2286_v26 = vld [vmem:[#allocation2 + $0x120] sm:$0xff]  ;;  %v2289_v58 = vld [vmem:[#allocation2 + $0x138] sm:$0xff] }
 0x64e   : > { %vm473_vm7 = vcmp.eq.s32.totalorder %v456_v35, %v5957_v20  ;;  %vm477_vm2 = vcmp.eq.s32.totalorder %v460_v4, %v5957_v20  ;;  %vm478_vm4 = vcmp.eq.s32.totalorder %v461_v37, %v5957_v20  ;;  %vm480_vm12 = vcmp.eq.s32.totalorder %v463_v40, %v5957_v20  ;;  %v2287_v35 = vld [vmem:[#allocation2 + $0x128] sm:$0xff]  ;;  %v2290_v37 = vld [vmem:[#allocation2 + $0x140] sm:$0xff] }
 0x64f   : > { %v1887_v3 = vmax.f32 %v1883_v44, %v1885_v0  ;;  %v1888_v5 = vmax.f32 %v1884_v50, %v1886_v33  ;;  %v457_v44 = vand.u32 15, %v5462_v38  ;;  %v458_v50 = vand.u32 15, %v5465_v39  ;;  %vm6001_vm5 = vmpackc.low %vm478_vm4, %vm477_vm2 }
 0x650   : > { %v462_v39 = vand.u32 15, %v5573_v27  ;;  %v1962_v27 = vld [vmem:[#allocation2] sm:$0xff] }
 0x651   : > { %v4846_v6 = vpack.c.bf16 %v1888_v5, %v1887_v3  ;;  %vm474_vm8 = vcmp.eq.s32.totalorder %v457_v44, %v5957_v20  ;;  %vm475_vm13 = vcmp.eq.s32.totalorder %v458_v50, %v5957_v20  ;;  %v4876_v5 = vpack.c.bf16 %v1963_v28, %v1962_v27  ;;  %v2288_v50 = vld [vmem:[#allocation2 + $0x130] sm:$0xff]  ;;  %v2293_v28 = vld [vmem:[#allocation2 + $0x158] sm:$0xff] }
 0x652   : > { %vm5977_vm11 = vmpackc.low %vm474_vm8, %vm473_vm7  ;;  %vm479_vm9 = vcmp.eq.s32.totalorder %v462_v39, %v5957_v20  ;;  %v4909_v44 = vpack.c.bf16 %v2287_v35, %v2286_v26  ;;  %v4912_v4 = vpack.c.bf16 %v2289_v58, %v2288_v50  ;;  %v2291_v39 = vld [vmem:[#allocation2 + $0x148] sm:$0xff]  ;;  %v2292_v27 = vld [vmem:[#allocation2 + $0x150] sm:$0xff] }
 0x653   : > { %4847 = vmatpush3.bf16.msra.mxu1 %v4846_v6  ;;  %4901 = vmatpush3.bf16.msra.mxu0 %v4846_v6  ;;  %vm5989_vm1 = vmpackc.low %vm476_vm14, %vm475_vm13  ;;  %v4915_v40 = vpack.c.bf16 %v2291_v39, %v2290_v37 }
 0x654   : > { %4848 = vmatprep.subr.bf16.mxu1 %v5230_v36  ;;  %4926 = vmatprep.subr.bf16.mxu0 %v5230_v36  ;;  %vm6011_vm15 = vmpackc.low %vm480_vm12, %vm479_vm9  ;;  %vm2545_vm12 = vcmask 64512  }
 0x656   : > { %4200 = vmatmul.mubr.msk.f32.vlgmr.msra.gmra.mrb[18].mxu1 %vm505_vm0, %v448_v51  ;;  %4284 = vmatmul.mubr.msk.f32.vlgmr.msra.gmra.mrb[6].mxu0 %vm505_vm0, %v453_v61  ;;  %v1965_v51 = vld [vmem:[#allocation2 + $0x18] sm:$0xff] }
 0x657   : > { %4850 = vmatpush3.bf16.msra.mxu1 %v4846_v6  ;;  %4206 = vmatprep.mubr.msk.f32.mxu1 %vm5232_vm6, %v5229_v8  ;;  %v1964_v6 = vld [vmem:[#allocation2 + $0x10] sm:$0xff] }
 0x658   : > { %4851 = vmatprep.subr.bf16.mxu1 %v5230_v36  ;;  %4353 = vmatprep.mubr.msk.f32.mxu0 %vm5232_vm6, %v5229_v8  ;;  %v4879_v10 = vpack.c.bf16 %v1965_v51, %v1964_v6  ;;  %v2296_v6 = vld [vmem:[#allocation2 + $0x170] sm:$0xff]  ;;  %v2297_v51 = vld [vmem:[#allocation2 + $0x178] sm:$0xff] }
 0x65a   : > { %4207 = vmatmul.mubr.msk.f32.vlgmr.msra.gmra.mrb[20].mxu1 %vm505_vm0, %v450_v11  ;;  %vm471_vm0 = vcmp.eq.s32.totalorder %v454_v30, %v5957_v20  ;;  %v1966_v11 = vld [vmem:[#allocation2 + $0x20] sm:$0xff] }
 0x65b   : > { %4853 = vmatpush3.bf16.msra.mxu1 %v4852_v62  ;;  %4241 = vmatprep.mubr.msk.f32.mxu1 %vm5232_vm6, %v5229_v8  ;;  %vm5969_vm10 = vmpackc.low %vm472_vm3, %vm471_vm0  ;;  %v1967_v62 = vld [vmem:[#allocation2 + $0x28] sm:$0xff] }
 0x65c   : > { %4854 = vmatprep.subr.bf16.mxu1 %v5230_v36  ;;  %4928 = vmatpush3.bf16.msk.msra.mxu0 %vm5969_vm10, %v5231_v48  ;;  %v4882_v43 = vpack.c.bf16 %v1967_v62, %v1966_v11  ;;  %v467_v62 = vand.u32 15, %v5604_v46 }
 0x65d   : > { %4929 = vmatprep.subr.bf16.mxu0 %v5230_v36 }
 0x65e   : > { %vm484_vm13 = vcmp.eq.s32.totalorder %v467_v62, %v5957_v20  ;;  %v2716_v62 = vld [vmem:[#allocation4 + $0xc8] sm:$0xff] }
 0x65f   : > { %4856 = vmatpush3.bf16.msra.mxu1 %v4855_v52  ;;  %v1969_v52 = vld [vmem:[#allocation2 + $0x38] sm:$0xff] }
 0x660   : > { %4857 = vmatprep.subr.bf16.mxu1 %v5230_v36  ;;  %4931 = vmatpush3.bf16.msk.msra.mxu0 %vm5977_vm11, %v5231_v48  ;;  %v4885_v53 = vpack.c.bf16 %v1969_v52, %v1968_v49 }
 0x661   : > { %4932 = vmatprep.subr.bf16.mxu0 %v5230_v36 }
 0x663   : > { %4859 = vmatpush3.bf16.msra.mxu1 %v4858_v47  ;;  %v1971_v47 = vld [vmem:[#allocation2 + $0x48] sm:$0xff] }
 0x664   : > { %4860 = vmatprep.subr.bf16.mxu1 %v5230_v36  ;;  %4934 = vmatpush3.bf16.msk.msra.mxu0 %vm5989_vm1, %v5231_v48  ;;  %v4888_v12 = vpack.c.bf16 %v1971_v47, %v1970_v34 }
 0x665   : > { %4935 = vmatprep.subr.bf16.mxu0 %v5230_v36 }
 0x667   : > { %4862 = vmatpush3.bf16.msra.mxu1 %v4861_v14  ;;  %v1973_v14 = vld [vmem:[#allocation2 + $0x58] sm:$0xff] }
 0x668   : > { %4863 = vmatprep.subr.bf16.mxu1 %v5230_v36  ;;  %4937 = vmatpush3.bf16.msk.msra.mxu0 %vm6001_vm5, %v5231_v48  ;;  %v4891_v56 = vpack.c.bf16 %v1973_v14, %v1972_v13 }
 0x669   : > { %4938 = vmatprep.subr.bf16.mxu0 %v5230_v36 }
 0x66b   : > { %4865 = vmatpush3.bf16.msra.mxu1 %v4864_v17  ;;  %v1975_v17 = vld [vmem:[#allocation2 + $0x68] sm:$0xff] }
 0x66c   : > { %4866 = vmatprep.subr.bf16.mxu1 %v5230_v36  ;;  %4940 = vmatpush3.bf16.msk.msra.mxu0 %vm6011_vm15, %v5231_v48  ;;  %v4894_v18 = vpack.c.bf16 %v1975_v17, %v1974_v16 }
 0x66d   : > { %4941 = vmatprep.subr.bf16.mxu0 %v5230_v36 }
 0x66f   : > { %4868 = vmatpush3.bf16.msra.mxu1 %v4867_v59  ;;  %v1977_v59 = vld [vmem:[#allocation2 + $0x78] sm:$0xff] }
 0x670   : > { %4869 = vmatprep.subr.bf16.mxu1 %v5230_v36  ;;  %v4897_v60 = vpack.c.bf16 %v1977_v59, %v1976_v19 }
 0x673   : > { %4871 = vmatpush3.bf16.msra.mxu1 %v4870_v22  ;;  %v2283_v22 = vld [vmem:[#allocation2 + $0x108] sm:$0xff] }
 0x674   : > { %4872 = vmatprep.subr.bf16.mxu1 %v5230_v36  ;;  %v4903_v23 = vpack.c.bf16 %v2283_v22, %v2282_v15 }
 0x677   : > { %4874 = vmatpush3.bf16.msra.mxu1 %v4873_v24  ;;  %v2285_v24 = vld [vmem:[#allocation2 + $0x118] sm:$0xff] }
 0x678   : > { %4875 = vmatprep.subr.bf16.mxu1 %v5230_v36  ;;  %v4906_v30 = vpack.c.bf16 %v2285_v24, %v2284_v29 }
 0x729   : > { %v1958_v63 = vpop.f32.mrb[18].mxu1  ;;  %v6019_v0 = vpop.f32.mrb[6].mxu0 }
 0x72a   : > { %v4201_v33 = vpop.f32.mrb[19].mxu1  ;;  %v4285_v3 = vpop.f32.mrb[7].mxu0 }
 0x72b   : > { %v2294_v33 = vld [vmem:[#allocation2 + $0x160] sm:$0xff]  ;;  %v2295_v3 = vld [vmem:[#allocation2 + $0x168] sm:$0xff] }
 0x72d   : > { %v2047_v61 = vpop.f32.mrb[20].mxu1 }
 0x72e   : > { %v4208_v7 = vpop.f32.mrb[21].mxu1  ;;  %4242 = vmatmul.mubr.f32.vlgmr.msra.gmra.mrb[22].mxu1 %v2047_v61  ;;  %v4924_v61 = vpack.c.bf16 %v2297_v51, %v2296_v6  ;;  %v2710_v6 = vld [vmem:[#allocation4 + $0x98] sm:$0xff]  ;;  %v2712_v51 = vld [vmem:[#allocation4 + $0xa8] sm:$0xff] }
 0x72f   : > { %4877 = vmatpush3.bf16.msra.mxu1 %v4876_v5  ;;  %4276 = vmatprep.mubr.msk.f32.mxu1 %vm5232_vm6, %v5229_v8  ;;  %v4921_v5 = vpack.c.bf16 %v2295_v3, %v2294_v33  ;;  %v464_v7 = vand.u32 15, %v5583_v31  ;;  %v2708_v33 = vld [vmem:[#allocation4 + $0x88] sm:$0xff] }
 0x730   : > { %4878 = vmatprep.subr.bf16.mxu1 %v5230_v36 }
 0x731   : > { %vm481_vm0 = vcmp.eq.s32.totalorder %v464_v7, %v5957_v20  ;;  %v2714_v7 = vld [vmem:[#allocation4 + $0xb8] sm:$0xff] }
 0x733   : > { %4880 = vmatpush3.bf16.msra.mxu1 %v4879_v10  ;;  %v465_v10 = vand.u32 15, %v5586_v32  ;;  %v468_v32 = vand.u32 15, %v5619_v54 }
 0x734   : > { %4881 = vmatprep.subr.bf16.mxu1 %v5230_v36 }
 0x735   : > { %vm482_vm3 = vcmp.eq.s32.totalorder %v465_v10, %v5957_v20  ;;  %vm485_vm2 = vcmp.eq.s32.totalorder %v468_v32, %v5957_v20 }
 0x736   : > { %vm6048_vm7 = vmpackc.low %vm482_vm3, %vm481_vm0 }
 0x737   : > { %4883 = vmatpush3.bf16.msra.mxu1 %v4882_v43  ;;  %4943 = vmatpush3.bf16.msk.msra.mxu0 %vm6048_vm7, %v5231_v48 }
 0x738   : > { %4884 = vmatprep.subr.bf16.mxu1 %v5230_v36  ;;  %4944 = vmatprep.subr.bf16.mxu0 %v5230_v36 }
 0x73b   : > { %4886 = vmatpush3.bf16.msra.mxu1 %v4885_v53 }
 0x73c   : > { %4887 = vmatprep.subr.bf16.mxu1 %v5230_v36 }
 0x73f   : > { %4889 = vmatpush3.bf16.msra.mxu1 %v4888_v12 }
 0x740   : > { %4890 = vmatprep.subr.bf16.mxu1 %v5230_v36 }
 0x743   : > { %4892 = vmatpush3.bf16.msra.mxu1 %v4891_v56 }
 0x744   : > { %4893 = vmatprep.subr.bf16.mxu1 %v5230_v36 }
 0x747   : > { %4895 = vmatpush3.bf16.msra.mxu1 %v4894_v18 }
 0x748   : > { %4896 = vmatprep.subr.bf16.mxu1 %v5230_v36 }
 0x74b   : > { %4898 = vmatpush3.bf16.msra.mxu1 %v4897_v60 }
 0x74c   : > { %4902 = vmatprep.subr.bf16.mxu1 %v5230_v36 }
 0x74e   : > { %4277 = vmatmul.mubr.f32.vlgmr.msra.gmra.mrb[22].mxu1 %v1958_v63  ;;  %v4918_v63 = vpack.c.bf16 %v2293_v28, %v2292_v27 }
 0x74f   : > { %4904 = vmatpush3.bf16.msra.mxu1 %v4903_v23  ;;  %4318 = vmatprep.mubr.msk.f32.mxu1 %vm5232_vm6, %v5229_v8 }
 0x750   : > { %4905 = vmatprep.subr.bf16.mxu1 %v5230_v36 }
 0x753   : > { %4907 = vmatpush3.bf16.msra.mxu1 %v4906_v30  ;;  %v2526_v30 = vld [vmem:[%s6255_s6] sm:$0x1] }
 0x754   : > { %4908 = vmatprep.subr.bf16.mxu1 %v5230_v36 }
 0x757   : > { %4910 = vmatpush3.bf16.msra.mxu1 %v4909_v44  ;;  %v2530_v44 = vld [vmem:[%s6255_s6 + $0x1] sm:$0x1] }
 0x758   : > { %4911 = vmatprep.subr.bf16.mxu1 %v5230_v36 }
 0x75b   : > { %4913 = vmatpush3.bf16.msra.mxu1 %v4912_v4 }
 0x75c   : > { %4914 = vmatprep.subr.bf16.mxu1 %v5230_v36 }
 0x75f   : > { %4916 = vmatpush3.bf16.msra.mxu1 %v4915_v40 }
 0x760   : > { %4917 = vmatprep.subr.bf16.mxu1 %v5230_v36 }
 0x763   : > { %4919 = vmatpush3.bf16.msra.mxu1 %v4918_v63  ;;  %v2707_v63 = vld [vmem:[#allocation4 + $0x80] sm:$0xff] }
 0x764   : > { %4920 = vmatprep.subr.bf16.mxu1 %v5230_v36  ;;  %v4975_v3 = vpack.c.bf16 %v2708_v33, %v2707_v63  ;;  %v2633_v63 = vld [vmem:[#allocation4 + $0x78] sm:$0xff] }
 0x767   : > { %4922 = vmatpush3.bf16.msra.mxu1 %v4921_v5  ;;  %v2709_v5 = vld [vmem:[#allocation4 + $0x90] sm:$0xff] }
 0x768   : > { %4923 = vmatprep.subr.bf16.mxu1 %v5230_v36 }
 0x76b   : > { %4925 = vmatpush3.bf16.msra.mxu1 %v4924_v61  ;;  %v2713_v61 = vld [vmem:[#allocation4 + $0xb0] sm:$0xff] }
 0x76c   : > { %4471 = vmatprep.subr.mxu1 %v5229_v8  ;;  %v4984_v10 = vpack.c.bf16 %v2714_v7, %v2713_v61  ;;  %v2941_v61 = vld [vmem:[#allocation4 + $0x128] sm:$0xff] }
 0x76e   : > { %4319 = vmatmul.mubr.f32.vlgmr.msra.gmra.mrb[22].mxu1 %v6019_v0  ;;  %v466_v0 = vand.u32 15, %v5601_v45  ;;  %v469_v45 = vand.u32 15, %v5622_v55 }
 0x76f   : > { %4473 = vmatprep.mubr.msk.f32.mxu1 %vm5232_vm6, %v5229_v8 }
 0x770   : > { %vm483_vm8 = vcmp.eq.s32.totalorder %v466_v0, %v5957_v20  ;;  %vm486_vm4 = vcmp.eq.s32.totalorder %v469_v45, %v5957_v20  ;;  %v2715_v0 = vld [vmem:[#allocation4 + $0xc0] sm:$0xff]  ;;  %v2717_v45 = vld [vmem:[#allocation4 + $0xd0] sm:$0xff] }
 0x771   : > { %vm6060_vm14 = vmpackc.low %vm484_vm13, %vm483_vm8  ;;  %v4987_v32 = vpack.c.bf16 %v2716_v62, %v2715_v0  ;;  %v2943_v0 = vld [vmem:[#allocation4 + $0x138] sm:$0xff] }
 0x772   : > { %4946 = vmatpush3.bf16.msk.msra.mxu0 %vm6060_vm14, %v5231_v48  ;;  %vm6072_vm9 = vmpackc.low %vm486_vm4, %vm485_vm2 }
 0x773   : > { %4947 = vmatprep.subr.bf16.mxu0 %v5230_v36 }
 0x776   : > { %4949 = vmatpush3.bf16.msk.msra.mxu0 %vm6072_vm9, %v5231_v48 }
 0x777   : > { %4950 = vmatprep.subr.bf16.mxu0 %v5230_v36 }
 0x841   : > { %v2364_v43 = vpop.f32.mrb[22].mxu1 }
 0x842   : > { %v2369_v54 = vrot.slane %v2364_v43, 4  ;;  %v4320_v49 = vpop.f32.mrb[23].mxu1  ;;  %v2375_v20 = vmul.f32 %v2364_v43, %v2364_v43 }
 0x843   : > { %v2719_v49 = vld [vmem:[#allocation4 + $0xe0] sm:$0xff] }
 0x844   : > { %v2370_v55 = vadd.f32 %v2369_v54, %v2364_v43  ;;  %v2376_v12 = vrot.slane %v2375_v20, 4 }
 0x846   : > { %v2371_v52 = vrot.slane %v2370_v55, 2  ;;  %v2377_v13 = vadd.f32 %v2376_v12, %v2375_v20  ;;  %v2618_v20 = vld [vmem:[#allocation4] sm:$0xff]  ;;  %v2619_v12 = vld [vmem:[#allocation4 + $0x8] sm:$0xff] }
 0x848   : > { %v2372_v53 = vadd.f32 %v2371_v52, %v2370_v55  ;;  %v2378_v14 = vrot.slane %v2377_v13, 2  ;;  %v2720_v55 = vld [vmem:[#allocation4 + $0xe8] sm:$0xff] }
 0x849   : > { %v4993_v52 = vpack.c.bf16 %v2720_v55, %v2719_v49  ;;  %v2947_v49 = vld [vmem:[#allocation4 + $0x158] sm:$0xff] }
 0x84a   : > { %v2373_v34 = vrot.slane %v2372_v53, 1  ;;  %v2379_v56 = vadd.f32 %v2378_v14, %v2377_v13 }
 0x84c   : > { %v2374_v47 = vadd.f32 %v2373_v34, %v2372_v53  ;;  %v2380_v16 = vrot.slane %v2379_v56, 1  ;;  %v2721_v53 = vld [vmem:[#allocation4 + $0xf0] sm:$0xff]  ;;  %v2722_v34 = vld [vmem:[#allocation4 + $0xf8] sm:$0xff] }
 0x84e   : > { %4354 = vmatmul.mubr.f32.vlgmr.msra.gmra.mrb[8].mxu0 %v2374_v47  ;;  %v2381_v17 = vadd.f32 %v2380_v16, %v2379_v56  ;;  %v4996_v47 = vpack.c.bf16 %v2722_v34, %v2721_v53  ;;  %v4999_v56 = vpack.c.bf16 %v2619_v12, %v2618_v20  ;;  %v2949_v53 = vld [vmem:[#allocation4 + $0x168] sm:$0xff]  ;;  %v2951_v20 = vld [vmem:[#allocation4 + $0x178] sm:$0xff] }
 0x84f   : > { %4952 = vmatpush3.bf16.msk.msra.mxu0 %vm5969_vm10, %v5231_v48  ;;  %4388 = vmatprep.mubr.msk.f32.mxu0 %vm5232_vm6, %v5229_v8 }
 0x850   : > { %4953 = vmatprep.subr.bf16.mxu0 %v5230_v36 }
 0x853   : > { %4955 = vmatpush3.bf16.msk.msra.mxu0 %vm5977_vm11, %v5231_v48 }
 0x854   : > { %4956 = vmatprep.subr.bf16.mxu0 %v5230_v36 }
 0x857   : > { %4958 = vmatpush3.bf16.msk.msra.mxu0 %vm5989_vm1, %v5231_v48 }
 0x858   : > { %4959 = vmatprep.subr.bf16.mxu0 %v5230_v36 }
 0x85b   : > { %4961 = vmatpush3.bf16.msk.msra.mxu0 %vm6001_vm5, %v5231_v48 }
 0x85c   : > { %4962 = vmatprep.subr.bf16.mxu0 %v5230_v36 }
 0x85f   : > { %4964 = vmatpush3.bf16.msk.msra.mxu0 %vm6011_vm15, %v5231_v48 }
 0x860   : > { %4965 = vmatprep.subr.bf16.mxu0 %v5230_v36 }
 0x863   : > { %4967 = vmatpush3.bf16.msk.msra.mxu0 %vm6048_vm7, %v5231_v48 }
 0x864   : > { %4968 = vmatprep.subr.bf16.mxu0 %v5230_v36 }
 0x867   : > { %4970 = vmatpush3.bf16.msk.msra.mxu0 %vm6060_vm14, %v5231_v48 }
 0x868   : > { %4971 = vmatprep.subr.bf16.mxu0 %v5230_v36 }
 0x86b   : > { %4973 = vmatpush3.bf16.msk.msra.mxu0 %vm6072_vm9, %v5231_v48 }
 0x86c   : > { %4391 = vmatprep.subr.mxu0 %v5229_v8 }
 0x86e   : > { %4389 = vmatmul.mubr.f32.vlgmr.msra.gmra.mrb[10].mxu0 %v2381_v17  ;;  %v2620_v17 = vld [vmem:[#allocation4 + $0x10] sm:$0xff] }
 0x86f   : > { %4393 = vmatprep.mubr.msk.f32.mxu0 %vm5232_vm6, %v5229_v8 }
 0x921   : > { %v2448_v18 = vpop.f32.mrb[8].mxu0 }
 0x922   : > { %v4355_v19 = vpop.f32.mrb[9].mxu0  ;;  %v2452_v59 = vmul.f32 0.015625, %v2448_v18  ;;  %v2621_v18 = vld [vmem:[#allocation4 + $0x18] sm:$0xff] }
 0x924   : > { %v2524_v15 = vmul.f32 %v2452_v59, %v2452_v59 }
 0x941   : > { %v2519_v60 = vpop.f32.mrb[10].mxu0 }
 0x942   : > { %v2523_v22 = vmul.f32 0.015625, %v2519_v60  ;;  %v4390_v23 = vpop.f32.mrb[11].mxu0 }
 0x943   : > { %v2623_v23 = vld [vmem:[#allocation4 + $0x28] sm:$0xff] }
 0x944   : > { %v2525_v29 = vsub.f32 %v2523_v22, %v2524_v15  ;;  %v5002_v15 = vpack.c.bf16 %v2621_v18, %v2620_v17  ;;  %v2622_v22 = vld [vmem:[#allocation4 + $0x20] sm:$0xff] }
 0x946   : > { %v2527_v24 = vadd.f32 1e-05, %v2525_v29  ;;  %v5005_v29 = vpack.c.bf16 %v2623_v23, %v2622_v22 }
 0x948   : > { %5149 = vrsqrt.f32 %v2527_v24  ;;  %v2624_v24 = vld [vmem:[#allocation4 + $0x30] sm:$0xff] }
 0x952   : > { %v5150_v26 = vpop.eup %5149 }
 0x953   : > { %v2529_v35 = vmul.f32 %v5150_v26, %v2526_v30  ;;  %v2625_v30 = vld [vmem:[#allocation4 + $0x38] sm:$0xff] }
 0x954   : > { %v5008_v26 = vpack.c.bf16 %v2625_v30, %v2624_v24 }
 0x955   : > { %v2531_v50 = vmul.f32 %v2529_v35, %v2452_v59  ;;  %v2536_v58 = vrot.slane %v2529_v35, %v5685_v57  ;;  %v2626_v35 = vld [vmem:[#allocation4 + $0x40] sm:$0xff] }
 0x957   : > { %v2532_v4 = vsub.f32 %v2530_v44, %v2531_v50  ;;  %v2537_v37 = vmul.f32 %v2536_v58, %v2364_v43  ;;  %v2718_v43 = vld [vmem:[#allocation4 + $0xd8] sm:$0xff]  ;;  %v2627_v44 = vld [vmem:[#allocation4 + $0x48] sm:$0xff]  ;;  %v2628_v58 = vld [vmem:[#allocation4 + $0x50] sm:$0xff] }
 0x958   : > { %v4990_v54 = vpack.c.bf16 %v2718_v43, %v2717_v45  ;;  %v5011_v50 = vpack.c.bf16 %v2627_v44, %v2626_v35  ;;  %v2945_v45 = vld [vmem:[#allocation4 + $0x148] sm:$0xff] }
 0x959   : > { %v2541_v39 = vrot.slane %v2532_v4, %v5685_v57  ;;  %v2629_v4 = vld [vmem:[#allocation4 + $0x58] sm:$0xff] }
 0x95b   : > { %v2542_v40 = vadd.f32 %v2541_v39, %v2537_v37  ;;  %v5014_v37 = vpack.c.bf16 %v2629_v4, %v2628_v58  ;;  %v2630_v39 = vld [vmem:[#allocation4 + $0x60] sm:$0xff] }
 0x95d   : > { %v2543_v27 = vmul.f32 0.01, %v2542_v40 }
 0x95f   : > { %v2544_v28 = vmax.f32 %v2542_v40, %v2543_v27  ;;  %v2631_v40 = vld [vmem:[#allocation4 + $0x68] sm:$0xff] }
 0x960   : > { %v5017_v27 = vpack.c.bf16 %v2631_v40, %v2630_v39 }
 0x961   : > { %4392 = vmatpush3.msra.mxu0 %v2544_v28  ;;  %4472 = vmatpush3.msra.mxu1 %v2544_v28 }
 0x962   : > { %4394 = vmatmul.mubr.msk.f32.vlgmr.msra.gmra.mrb[12].mxu0 %vm2545_vm12, %v5384_v9  ;;  %4396 = vmatprep.subr.mxu0 %v5229_v8  ;;  %v4978_v9 = vpack.c.bf16 %v2710_v6, %v2709_v5  ;;  %v2937_v5 = vld [vmem:[#allocation4 + $0x108] sm:$0xff] }
 0x963   : > { %4397 = vmatpush3.msra.mxu0 %v2544_v28  ;;  %4398 = vmatprep.mubr.msk.f32.mxu0 %vm5232_vm6, %v5229_v8  ;;  %v2632_v28 = vld [vmem:[#allocation4 + $0x70] sm:$0xff] }
 0x964   : > { %4474 = vmatmul.mubr.msk.f32.vlgmr.msra.gmra.mrb[24].mxu1 %vm2545_vm12, %v5428_v25  ;;  %4974 = vmatprep.subr.bf16.mxu0 %v5230_v36  ;;  %v2711_v25 = vld [vmem:[#allocation4 + $0xa0] sm:$0xff]  ;;  %v5020_v33 = vpack.c.bf16 %v2633_v63, %v2632_v28 }
 0x965   : > { %5046 = vmatprep.subr.bf16.mxu1 %v5230_v36  ;;  %4543 = vmatprep.mubr.msk.f32.mxu1 %vm5232_vm6, %v5229_v8 }
 0x966   : > { %4399 = vmatmul.mubr.msk.f32.vlgmr.msra.gmra.mrb[14].mxu0 %vm2545_vm12, %v5414_v21  ;;  %5048 = vmatpush3.bf16.msk.msra.mxu1 %vm5969_vm10, %v5231_v48  ;;  %v4981_v21 = vpack.c.bf16 %v2712_v51, %v2711_v25  ;;  %v2939_v25 = vld [vmem:[#allocation4 + $0x118] sm:$0xff] }
 0x967   : > { %4976 = vmatpush3.bf16.msra.mxu0 %v4975_v3  ;;  %4433 = vmatprep.mubr.msk.f32.mxu0 %vm5232_vm6, %v5229_v8  ;;  %v2936_v3 = vld [vmem:[#allocation4 + $0x100] sm:$0xff] }
 0x968   : > { %4977 = vmatprep.subr.bf16.mxu0 %v5230_v36  ;;  %5049 = vmatprep.subr.bf16.mxu1 %v5230_v36  ;;  %v5023_v6 = vpack.c.bf16 %v2937_v5, %v2936_v3 }
 0x96a   : > { %5051 = vmatpush3.bf16.msk.msra.mxu1 %vm5977_vm11, %v5231_v48 }
 0x96b   : > { %4979 = vmatpush3.bf16.msra.mxu0 %v4978_v9  ;;  %5052 = vmatprep.subr.bf16.mxu1 %v5230_v36  ;;  %v2938_v9 = vld [vmem:[#allocation4 + $0x110] sm:$0xff] }
 0x96c   : > { %4980 = vmatprep.subr.bf16.mxu0 %v5230_v36  ;;  %v5026_v51 = vpack.c.bf16 %v2939_v25, %v2938_v9 }
 0x96e   : > { %5054 = vmatpush3.bf16.msk.msra.mxu1 %vm5989_vm1, %v5231_v48 }
 0x96f   : > { %4982 = vmatpush3.bf16.msra.mxu0 %v4981_v21  ;;  %5055 = vmatprep.subr.bf16.mxu1 %v5230_v36  ;;  %v2940_v21 = vld [vmem:[#allocation4 + $0x120] sm:$0xff] }
 0x970   : > { %4983 = vmatprep.subr.bf16.mxu0 %v5230_v36  ;;  %v5029_v7 = vpack.c.bf16 %v2941_v61, %v2940_v21 }
 0x972   : > { %5057 = vmatpush3.bf16.msk.msra.mxu1 %vm6001_vm5, %v5231_v48 }
 0x973   : > { %4985 = vmatpush3.bf16.msra.mxu0 %v4984_v10  ;;  %5058 = vmatprep.subr.bf16.mxu1 %v5230_v36  ;;  %v2942_v10 = vld [vmem:[#allocation4 + $0x130] sm:$0xff] }
 0x974   : > { %4986 = vmatprep.subr.bf16.mxu0 %v5230_v36  ;;  %v5032_v62 = vpack.c.bf16 %v2943_v0, %v2942_v10 }
 0x976   : > { %5060 = vmatpush3.bf16.msk.msra.mxu1 %vm6011_vm15, %v5231_v48 }
 0x977   : > { %4988 = vmatpush3.bf16.msra.mxu0 %v4987_v32  ;;  %5061 = vmatprep.subr.bf16.mxu1 %v5230_v36  ;;  %v2944_v32 = vld [vmem:[#allocation4 + $0x140] sm:$0xff] }
 0x978   : > { %4989 = vmatprep.subr.bf16.mxu0 %v5230_v36  ;;  %v5035_v43 = vpack.c.bf16 %v2945_v45, %v2944_v32 }
 0x97a   : > { %5063 = vmatpush3.bf16.msk.msra.mxu1 %vm6048_vm7, %v5231_v48 }
 0x97b   : > { %4991 = vmatpush3.bf16.msra.mxu0 %v4990_v54  ;;  %5064 = vmatprep.subr.bf16.mxu1 %v5230_v36  ;;  %v2946_v54 = vld [vmem:[#allocation4 + $0x150] sm:$0xff] }
 0x97c   : > { %4992 = vmatprep.subr.bf16.mxu0 %v5230_v36  ;;  %v5038_v55 = vpack.c.bf16 %v2947_v49, %v2946_v54 }
 0x97e   : > { %5066 = vmatpush3.bf16.msk.msra.mxu1 %vm6060_vm14, %v5231_v48 }
 0x97f   : > { %4994 = vmatpush3.bf16.msra.mxu0 %v4993_v52  ;;  %5067 = vmatprep.subr.bf16.mxu1 %v5230_v36  ;;  %v2948_v52 = vld [vmem:[#allocation4 + $0x160] sm:$0xff] }
 0x980   : > { %4995 = vmatprep.subr.bf16.mxu0 %v5230_v36  ;;  %v5041_v34 = vpack.c.bf16 %v2949_v53, %v2948_v52 }
 0x982   : > { %5069 = vmatpush3.bf16.msk.msra.mxu1 %vm6072_vm9, %v5231_v48 }
 0x983   : > { %4997 = vmatpush3.bf16.msra.mxu0 %v4996_v47  ;;  %5070 = vmatprep.subr.bf16.mxu1 %v5230_v36  ;;  %v2950_v47 = vld [vmem:[#allocation4 + $0x170] sm:$0xff] }
 0x984   : > { %4998 = vmatprep.subr.bf16.mxu0 %v5230_v36  ;;  %v5044_v12 = vpack.c.bf16 %v2951_v20, %v2950_v47 }
 0xa35   : > { %v2614_v13 = vpop.f32.mrb[12].mxu0 }
 0xa36   : > { %v4395_v14 = vpop.f32.mrb[13].mxu0 }
 0xa37   : > { %v6179_v16 = vpop.f32.mrb[24].mxu1 }
 0xa38   : > { %v4475_v19 = vpop.f32.mrb[25].mxu1 }
 0xa39   : > { %v2702_v59 = vpop.f32.mrb[14].mxu0 }
 0xa3a   : > { %4434 = vmatmul.mubr.f32.vlgmr.msra.gmra.mrb[16].mxu0 %v2702_v59  ;;  %v4400_v60 = vpop.f32.mrb[15].mxu0 }
 0xa3b   : > { %5000 = vmatpush3.bf16.msra.mxu0 %v4999_v56  ;;  %4468 = vmatprep.mubr.msk.f32.mxu0 %vm5232_vm6, %v5229_v8 }
 0xa3c   : > { %5001 = vmatprep.subr.bf16.mxu0 %v5230_v36 }
 0xa3f   : > { %5003 = vmatpush3.bf16.msra.mxu0 %v5002_v15 }
 0xa40   : > { %5004 = vmatprep.subr.bf16.mxu0 %v5230_v36 }
 0xa43   : > { %5006 = vmatpush3.bf16.msra.mxu0 %v5005_v29 }
 0xa44   : > { %5007 = vmatprep.subr.bf16.mxu0 %v5230_v36 }
 0xa47   : > { %5009 = vmatpush3.bf16.msra.mxu0 %v5008_v26 }
 0xa48   : > { %5010 = vmatprep.subr.bf16.mxu0 %v5230_v36 }
 0xa4b   : > { %5012 = vmatpush3.bf16.msra.mxu0 %v5011_v50 }
 0xa4c   : > { %5013 = vmatprep.subr.bf16.mxu0 %v5230_v36 }
 0xa4f   : > { %5015 = vmatpush3.bf16.msra.mxu0 %v5014_v37 }
 0xa50   : > { %5016 = vmatprep.subr.bf16.mxu0 %v5230_v36 }
 0xa53   : > { %5018 = vmatpush3.bf16.msra.mxu0 %v5017_v27 }
 0xa54   : > { %5019 = vmatprep.subr.bf16.mxu0 %v5230_v36 }
 0xa57   : > { %5021 = vmatpush3.bf16.msra.mxu0 %v5020_v33 }
 0xa58   : > { %5022 = vmatprep.subr.bf16.mxu0 %v5230_v36 }
 0xa5a   : > { %4469 = vmatmul.mubr.f32.vlgmr.msra.gmra.mrb[16].mxu0 %v2614_v13 }
 0xa5b   : > { %5024 = vmatpush3.bf16.msra.mxu0 %v5023_v6  ;;  %4508 = vmatprep.mubr.msk.f32.mxu0 %vm5232_vm6, %v5229_v8 }
 0xa5c   : > { %5025 = vmatprep.subr.bf16.mxu0 %v5230_v36 }
 0xa5f   : > { %5027 = vmatpush3.bf16.msra.mxu0 %v5026_v51 }
 0xa60   : > { %5028 = vmatprep.subr.bf16.mxu0 %v5230_v36 }
 0xa63   : > { %5030 = vmatpush3.bf16.msra.mxu0 %v5029_v7 }
 0xa64   : > { %5031 = vmatprep.subr.bf16.mxu0 %v5230_v36 }
 0xa67   : > { %5033 = vmatpush3.bf16.msra.mxu0 %v5032_v62 }
 0xa68   : > { %5034 = vmatprep.subr.bf16.mxu0 %v5230_v36 }
 0xa6b   : > { %5036 = vmatpush3.bf16.msra.mxu0 %v5035_v43 }
 0xa6c   : > { %5037 = vmatprep.subr.bf16.mxu0 %v5230_v36 }
 0xa6f   : > { %5039 = vmatpush3.bf16.msra.mxu0 %v5038_v55 }
 0xa70   : > { %5040 = vmatprep.subr.bf16.mxu0 %v5230_v36 }
 0xa73   : > { %5042 = vmatpush3.bf16.msra.mxu0 %v5041_v34 }
 0xa74   : > { %5043 = vmatprep.subr.bf16.mxu0 %v5230_v36 }
 0xa77   : > { %5045 = vmatpush3.bf16.msra.mxu0 %v5044_v12 }
 0xa7a   : > { %4509 = vmatmul.mubr.f32.vlgmr.msra.gmra.mrb[16].mxu0 %v6179_v16 }
 0xb4d   : > { %v3018_v13 = vpop.f32.mrb[16].mxu0 }
 0xb4e   : > { %v3023_v14 = vrot.slane %v3018_v13, 4  ;;  %v4510_v56 = vpop.f32.mrb[17].mxu0  ;;  %v3029_v16 = vmul.f32 %v3018_v13, %v3018_v13 }
 0xb50   : > { %v3024_v17 = vadd.f32 %v3023_v14, %v3018_v13  ;;  %v3030_v15 = vrot.slane %v3029_v16, 4 }
 0xb52   : > { %v3025_v18 = vrot.slane %v3024_v17, 2 }
 0xb54   : > { %v3026_v19 = vadd.f32 %v3025_v18, %v3024_v17 }
 0xb56   : > { %v3027_v59 = vrot.slane %v3026_v19, 1 }
 0xb58   : > { %v3028_v60 = vadd.f32 %v3027_v59, %v3026_v19 }
 0xb5a   : > { %4544 = vmatmul.mubr.f32.vlgmr.msra.gmra.mrb[26].mxu1 %v3028_v60 }
 0xb5b   : > { %5072 = vmatpush3.bf16.msk.msra.mxu1 %vm5969_vm10, %v5231_v48  ;;  %4578 = vmatprep.mubr.msk.f32.mxu1 %vm5232_vm6, %v5229_v8  ;;  %v3031_v8 = vadd.f32 %v3030_v15, %v3029_v16 }
 0xb5c   : > { %5073 = vmatprep.subr.bf16.mxu1 %v5230_v36 }
 0xb5d   : > { %v3032_v1 = vrot.slane %v3031_v8, 2 }
 0xb5f   : > { %5075 = vmatpush3.bf16.msk.msra.mxu1 %vm5977_vm11, %v5231_v48  ;;  %v3033_v2 = vadd.f32 %v3032_v1, %v3031_v8 }
 0xb60   : > { %5076 = vmatprep.subr.bf16.mxu1 %v5230_v36 }
 0xb61   : > { %v3034_v38 = vrot.slane %v3033_v2, 1 }
 0xb63   : > { %5078 = vmatpush3.bf16.msk.msra.mxu1 %vm5989_vm1, %v5231_v48  ;;  %v3035_v41 = vadd.f32 %v3034_v38, %v3033_v2 }
 0xb64   : > { %5079 = vmatprep.subr.bf16.mxu1 %v5230_v36 }
 0xb67   : > { %5081 = vmatpush3.bf16.msk.msra.mxu1 %vm6001_vm5, %v5231_v48 }
 0xb68   : > { %5082 = vmatprep.subr.bf16.mxu1 %v5230_v36 }
 0xb6b   : > { %5084 = vmatpush3.bf16.msk.msra.mxu1 %vm6011_vm15, %v5231_v48 }
 0xb6c   : > { %5085 = vmatprep.subr.bf16.mxu1 %v5230_v36 }
 0xb6f   : > { %5087 = vmatpush3.bf16.msk.msra.mxu1 %vm6048_vm7, %v5231_v48 }
 0xb70   : > { %5088 = vmatprep.subr.bf16.mxu1 %v5230_v36 }
 0xb73   : > { %5090 = vmatpush3.bf16.msk.msra.mxu1 %vm6060_vm14, %v5231_v48 }
 0xb74   : > { %5091 = vmatprep.subr.bf16.mxu1 %v5230_v36  ;;  %v3180_v36 = vld [vmem:[%s6257_s8] sm:$0x1] }
 0xb77   : > { %5093 = vmatpush3.bf16.msk.msra.mxu1 %vm6072_vm9, %v5231_v48  ;;  %v3184_v48 = vld [vmem:[%s6257_s8 + $0x1] sm:$0x1] }
 0xb7a   : > { %4579 = vmatmul.mubr.f32.vlgmr.msra.gmra.mrb[28].mxu1 %v3035_v41 }
 0xc2d   : > { %v3102_v42 = vpop.f32.mrb[26].mxu1 }
 0xc2e   : > { %v4545_v22 = vpop.f32.mrb[27].mxu1  ;;  %v3106_v11 = vmul.f32 0.015625, %v3102_v42 }
 0xc30   : > { %v3178_v29 = vmul.f32 %v3106_v11, %v3106_v11 }
 0xc4d   : > { %v3173_v23 = vpop.f32.mrb[28].mxu1 }
 0xc4e   : > { %v3177_v24 = vmul.f32 0.015625, %v3173_v23  ;;  %v4580_v30 = vpop.f32.mrb[29].mxu1 }
 0xc50   : > { %v3179_v26 = vsub.f32 %v3177_v24, %v3178_v29 }
 0xc52   : > { %v3181_v31 = vadd.f32 1e-05, %v3179_v26 }
 0xc54   : > { %5151 = vrsqrt.f32 %v3181_v31 }
 0xc5e   : > { %v5152_v35 = vpop.eup %5151 }
 0xc5f   : > { %v3183_v46 = vmul.f32 %v5152_v35, %v3180_v36 }
 0xc61   : > { %v3185_v44 = vmul.f32 %v3183_v46, %v3106_v11  ;;  %v3190_v50 = vrot.slane %v3183_v46, %v5685_v57 }
 0xc63   : > { %v3186_v58 = vsub.f32 %v3184_v48, %v3185_v44  ;;  %v3191_v4 = vmul.f32 %v3190_v50, %v3018_v13 }
 0xc65   : > { %v3195_v37 = vrot.slane %v3186_v58, %v5685_v57 }
 0xc67   : > { %v3196_v39 = vadd.f32 %v3195_v37, %v3191_v4 }
 0xc69   : > { %v3197_v40 = vmul.f32 0.01, %v3196_v39 }
 0xc6b   : > { %v3198_v27 = vmax.f32 %v3196_v39, %v3197_v40 }
 0xc6d   : > { %3199 = vst [vmem:[%s360_s20] sm:$0xff] %v3198_v27 }
 0xc6e PF: > { %s21_s30 = sadd.s32 1, %s5223_s30  }
 0xc6f   : > { %p18_p5 = scmp.ge.s32.totalorder %s21_s30, 4  }
 0xc71   :  { %20 = sbr.rel (!%p18_p5) target bundleno = 2 (0x2), region = 103 }
 0xc78   :  { %3219 = vsyncpa [#allocation3], 1 }
 0xc79   :  { %3221 = vsyncpa [#allocation3 + $0x1], 1 }
 0xc7a   :  { %3222 = vsyncpa [#allocation5], 1 }

</bundles_post_ra>
